<compile_context>
chip_gen: v7x
topology: tpu7x:2x2x1
jax: 0.10.0
libtpu: 0.0.40
codegen_flags: <defaults>
</compile_context>

<pallas_src>
import functools

import jax
import jax.numpy as jnp
from jax import lax
from jax.experimental import pallas as pl
from jax.experimental.pallas import tpu as pltpu

# ---------------- tiny-KoBART config (small stand-in for hidden=768) ----------------
B = 2           # batch
T_ENC = 16      # encoder sequence length
T_DEC = 8       # decoder sequence length
H = 32          # hidden size (768 in real KoBART; linear_copy is Linear(H, 1))
N_HEADS = 4
HEAD_DIM = H // N_HEADS
FFN = 64
VOCAB = 256
MAX_POS = 32
PAD_ID = 3
IGNORE_INDEX = -100

MM_DTYPE = jnp.bfloat16   # MXU operand dtype (f32 accumulation inside the kernels)
NEG_INF = -1e9

# TODO(synk): at this toy config (H=32, FFN=64, 3H=96) output tiles are < 128 lanes, so
# stores lower to masked vst; at real KoBART (768/3072/30080) all tiles are lane-dense.


def _gelu(x):
    c = 0.7978845608028654  # sqrt(2/pi)
    return 0.5 * x * (1.0 + jnp.tanh(c * (x + 0.044715 * x * x * x)))


# =====================================================================================
# Pallas kernel 1: fused dense (matmul + bias [+ GELU])
#   - single-step specialization when the whole K reduction fits one tile
#   - K-tiled accumulator variant for production sizes (tk=256)
# =====================================================================================
def _dense_single_kernel(a_ref, w_ref, b_ref, o_ref, *, activation):
    y = jnp.dot(a_ref[...].astype(MM_DTYPE), w_ref[...],
                preferred_element_type=jnp.float32) + b_ref[...]
    if activation == "gelu":
        y = _gelu(y)
    o_ref[...] = y.astype(o_ref.dtype)


def _dense_acc_kernel(a_ref, w_ref, b_ref, o_ref, acc_ref, *, activation):
    @pl.when(pl.program_id(2) == 0)
    def _():
        acc_ref[...] = jnp.zeros_like(acc_ref)

    acc_ref[...] += jnp.dot(a_ref[...].astype(MM_DTYPE), w_ref[...],
                            preferred_element_type=jnp.float32)

    @pl.when(pl.program_id(2) == pl.num_programs(2) - 1)
    def _():
        y = acc_ref[...] + b_ref[...]
        if activation == "gelu":
            y = _gelu(y)
        o_ref[...] = y.astype(o_ref.dtype)


def fused_dense(x, w, b, activation=None, out_dtype=jnp.float32,
                tm=256, tn=256, tk=256):
    """y = act(x @ w + b).  x: (..., K) f32, w: (K, N) bf16, b: (N,)."""
    lead = x.shape[:-1]
    a = x.reshape(-1, x.shape[-1])
    M, K = a.shape
    N = w.shape[-1]
    tm, tn, tk = min(tm, M), min(tn, N), min(tk, K)
    assert M % tm == 0 and N % tn == 0 and K % tk == 0, (M, N, K, tm, tn, tk)

    w = w.astype(MM_DTYPE)                      # no-op: weights already stored bf16
    b2 = b.reshape(1, N).astype(jnp.float32)

    cost = pl.CostEstimate(
        flops=int(2 * M * N * K),
        transcendentals=int(M * N) if activation == "gelu" else 0,
        bytes_accessed=int(M * K * 4 + K * N * 2 + N * 4 + M * N * 4),
    )

    if K == tk:
        # Single K step: no accumulator scratch, no reduction grid axis, no pl.when.
        out = pl.pallas_call(
            functools.partial(_dense_single_kernel, activation=activation),
            out_shape=jax.ShapeDtypeStruct((M, N), out_dtype),
            grid_spec=pltpu.PrefetchScalarGridSpec(
                num_scalar_prefetch=0,
                grid=(M // tm, N // tn),
                in_specs=[
                    pl.BlockSpec((tm, K), lambda i, j: (i, 0)),
                    pl.BlockSpec((K, tn), lambda i, j: (0, j)),
                    pl.BlockSpec((1, tn), lambda i, j: (0, j)),
                ],
                out_specs=pl.BlockSpec((tm, tn), lambda i, j: (i, j)),
            ),
            compiler_params=pltpu.CompilerParams(
                dimension_semantics=("parallel", "parallel")),
            cost_estimate=cost,
        )(a, w, b2)
    else:
        # K-tiled accumulator path (production sizes). If LM-head DMA is exposed on
        # v5e, add pipeline_mode=pl.Buffered(3) to the weight BlockSpec.
        out = pl.pallas_call(
            functools.partial(_dense_acc_kernel, activation=activation),
            out_shape=jax.ShapeDtypeStruct((M, N), out_dtype),
            grid_spec=pltpu.PrefetchScalarGridSpec(
                num_scalar_prefetch=0,
                grid=(M // tm, N // tn, K // tk),
                in_specs=[
                    pl.BlockSpec((tm, tk), lambda i, j, k: (i, k)),
                    pl.BlockSpec((tk, tn), lambda i, j, k: (k, j)),
                    pl.BlockSpec((1, tn), lambda i, j, k: (0, j)),
                ],
                out_specs=pl.BlockSpec((tm, tn), lambda i, j, k: (i, j)),
                scratch_shapes=[pltpu.VMEM((tm, tn), jnp.float32)],
            ),
            compiler_params=pltpu.CompilerParams(
                dimension_semantics=("parallel", "parallel", "arbitrary")),
            cost_estimate=cost,
        )(a, w, b2)
    return out.reshape(lead + (N,))


# =====================================================================================
# Pallas kernel 2: fused FFN  (gelu(x@w1+b1) @ w2 + b2) in one pallas_call
# =====================================================================================
def _ffn_kernel(x_ref, w1_ref, b1_ref, w2_ref, b2_ref, o_ref):
    x = x_ref[...].astype(MM_DTYPE)                                       # (tm, H)
    h = jnp.dot(x, w1_ref[...], preferred_element_type=jnp.float32) + b1_ref[...]
    h = _gelu(h)
    y = jnp.dot(h.astype(MM_DTYPE), w2_ref[...],
                preferred_element_type=jnp.float32) + b2_ref[...]
    o_ref[...] = y.astype(o_ref.dtype)


def fused_ffn(x, p, tm=256):
    lead = x.shape[:-1]
    a = x.reshape(-1, x.shape[-1])
    M, Hh = a.shape
    F = p['w1'].shape[-1]
    tm = min(tm, M)
    assert M % tm == 0
    # TODO(synk): at real KoBART (H=768, FFN=3072) tile FFN if VMEM budget is tight.
    out = pl.pallas_call(
        _ffn_kernel,
        out_shape=jax.ShapeDtypeStruct((M, Hh), jnp.float32),
        grid_spec=pltpu.PrefetchScalarGridSpec(
            num_scalar_prefetch=0,
            grid=(M // tm,),
            in_specs=[
                pl.BlockSpec((tm, Hh), lambda i: (i, 0)),
                pl.BlockSpec((Hh, F), lambda i: (0, 0)),
                pl.BlockSpec((1, F), lambda i: (0, 0)),
                pl.BlockSpec((F, Hh), lambda i: (0, 0)),
                pl.BlockSpec((1, Hh), lambda i: (0, 0)),
            ],
            out_specs=pl.BlockSpec((tm, Hh), lambda i: (i, 0)),
        ),
        compiler_params=pltpu.CompilerParams(dimension_semantics=("parallel",)),
        cost_estimate=pl.CostEstimate(
            flops=int(4 * M * Hh * F),
            transcendentals=int(M * F),
            bytes_accessed=int(2 * M * Hh * 4 + 2 * Hh * F * 2 + (F + Hh) * 4),
        ),
    )(a, p['w1'], p['b1'].reshape(1, F), p['w2'], p['b2'].reshape(1, Hh))
    return out.reshape(lead + (Hh,))


# =====================================================================================
# Pallas kernel 3: fused self-attention block  (QKV proj + masked softmax + out proj)
# =====================================================================================
def _self_attn_kernel(x_ref, mask_ref, wqkv_ref, bqkv_ref, wo_ref, bo_ref,
                      o_ref, ctx_ref, *, n_heads, head_dim):
    Hh = n_heads * head_dim
    x = x_ref[0].astype(MM_DTYPE)                                         # (T, H)
    qkv = jnp.dot(x, wqkv_ref[...], preferred_element_type=jnp.float32) + bqkv_ref[...]
    mask = mask_ref[0]                                                    # (T, T) f32
    scale = head_dim ** -0.5
    for h in range(n_heads):                                              # static loop
        lo = h * head_dim
        q = qkv[:, lo:lo + head_dim] * scale
        k = qkv[:, Hh + lo:Hh + lo + head_dim]
        v = qkv[:, 2 * Hh + lo:2 * Hh + lo + head_dim]
        s = lax.dot_general(q, k, (((1,), (1,)), ((), ())),
                            preferred_element_type=jnp.float32)           # (T, T)
        s = jnp.where(mask > 0.0, s, NEG_INF)
        m = jnp.max(s, axis=-1, keepdims=True)
        e = jnp.exp(s - m)
        p = e / jnp.sum(e, axis=-1, keepdims=True)
        ctx_ref[:, lo:lo + head_dim] = jnp.dot(
            p.astype(MM_DTYPE), v.astype(MM_DTYPE),
            preferred_element_type=jnp.float32)
    y = jnp.dot(ctx_ref[...].astype(MM_DTYPE), wo_ref[...],
                preferred_element_type=jnp.float32) + bo_ref[...]
    o_ref[0] = y.astype(o_ref.dtype)


def mha_self(x, p, mask):
    Bb, T, Hh = x.shape
    return pl.pallas_call(
        functools.partial(_self_attn_kernel, n_heads=N_HEADS, head_dim=HEAD_DIM),
        out_shape=jax.ShapeDtypeStruct((Bb, T, Hh), jnp.float32),
        grid_spec=pltpu.PrefetchScalarGridSpec(
            num_scalar_prefetch=0,
            grid=(Bb,),
            in_specs=[
                pl.BlockSpec((1, T, Hh), lambda b: (b, 0, 0)),
                pl.BlockSpec((1, T, T), lambda b: (b, 0, 0)),
                pl.BlockSpec((Hh, 3 * Hh), lambda b: (0, 0)),
                pl.BlockSpec((1, 3 * Hh), lambda b: (0, 0)),
                pl.BlockSpec((Hh, Hh), lambda b: (0, 0)),
                pl.BlockSpec((1, Hh), lambda b: (0, 0)),
            ],
            out_specs=pl.BlockSpec((1, T, Hh), lambda b: (b, 0, 0)),
            scratch_shapes=[pltpu.VMEM((T, Hh), jnp.float32)],
        ),
        compiler_params=pltpu.CompilerParams(dimension_semantics=("parallel",)),
        cost_estimate=pl.CostEstimate(
            flops=int(Bb * (6 * T * Hh * Hh + 4 * T * T * Hh + 2 * T * Hh * Hh)),
            transcendentals=int(Bb * N_HEADS * T * T),
            bytes_accessed=int(Bb * T * Hh * 8 + Bb * T * T * 4 + 4 * Hh * Hh * 2),
        ),
    )(x, mask, p['wqkv'], p['bqkv'].reshape(1, 3 * Hh),
      p['wo'], p['bo'].reshape(1, Hh))


# =====================================================================================
# Pallas kernel 4: fused cross-attention block (Q/KV proj + attention + out proj),
# also emits the per-head attention probabilities consumed by the copy loss.
# =====================================================================================
def _cross_attn_kernel(xq_ref, xkv_ref, mask_ref, wq_ref, bq_ref,
                       wkv_ref, bkv_ref, wo_ref, bo_ref,
                       o_ref, probs_ref, ctx_ref, *, n_heads, head_dim):
    Hh = n_heads * head_dim
    xq = xq_ref[0].astype(MM_DTYPE)                                       # (Td, H)
    xkv = xkv_ref[0].astype(MM_DTYPE)                                     # (Te, H)
    q_all = jnp.dot(xq, wq_ref[...], preferred_element_type=jnp.float32) + bq_ref[...]
    kv = jnp.dot(xkv, wkv_ref[...], preferred_element_type=jnp.float32) + bkv_ref[...]
    mask = mask_ref[0]                                                    # (Td, Te)
    scale = head_dim ** -0.5
    for h in range(n_heads):                                              # static loop
        lo = h * head_dim
        q = q_all[:, lo:lo + head_dim] * scale
        k = kv[:, lo:lo + head_dim]
        v = kv[:, Hh + lo:Hh + lo + head_dim]
        s = lax.dot_general(q, k, (((1,), (1,)), ((), ())),
                            preferred_element_type=jnp.float32)           # (Td, Te)
        s = jnp.where(mask > 0.0, s, NEG_INF)
        m = jnp.max(s, axis=-1, keepdims=True)
        e = jnp.exp(s - m)
        p = e / jnp.sum(e, axis=-1, keepdims=True)
        probs_ref[0, h] = p
        ctx_ref[:, lo:lo + head_dim] = jnp.dot(
            p.astype(MM_DTYPE), v.astype(MM_DTYPE),
            preferred_element_type=jnp.float32)
    y = jnp.dot(ctx_ref[...].astype(MM_DTYPE), wo_ref[...],
                preferred_element_type=jnp.float32) + bo_ref[...]
    o_ref[0] = y.astype(o_ref.dtype)


def mha_cross(xq, xkv, p, mask):
    Bb, Tq, Hh = xq.shape
    Tk = xkv.shape[1]
    out, probs = pl.pallas_call(
        functools.partial(_cross_attn_kernel, n_heads=N_HEADS, head_dim=HEAD_DIM),
        out_shape=(jax.ShapeDtypeStruct((Bb, Tq, Hh), jnp.float32),
                   jax.ShapeDtypeStruct((Bb, N_HEADS, Tq, Tk), jnp.float32)),
        grid_spec=pltpu.PrefetchScalarGridSpec(
            num_scalar_prefetch=0,
            grid=(Bb,),
            in_specs=[
                pl.BlockSpec((1, Tq, Hh), lambda b: (b, 0, 0)),
                pl.BlockSpec((1, Tk, Hh), lambda b: (b, 0, 0)),
                pl.BlockSpec((1, Tq, Tk), lambda b: (b, 0, 0)),
                pl.BlockSpec((Hh, Hh), lambda b: (0, 0)),
                pl.BlockSpec((1, Hh), lambda b: (0, 0)),
                pl.BlockSpec((Hh, 2 * Hh), lambda b: (0, 0)),
                pl.BlockSpec((1, 2 * Hh), lambda b: (0, 0)),
                pl.BlockSpec((Hh, Hh), lambda b: (0, 0)),
                pl.BlockSpec((1, Hh), lambda b: (0, 0)),
            ],
            out_specs=(pl.BlockSpec((1, Tq, Hh), lambda b: (b, 0, 0)),
                       # 4-D block -> 4 block indices (this was the previous bug)
                       pl.BlockSpec((1, N_HEADS, Tq, Tk), lambda b: (b, 0, 0, 0))),
            scratch_shapes=[pltpu.VMEM((Tq, Hh), jnp.float32)],
        ),
        compiler_params=pltpu.CompilerParams(dimension_semantics=("parallel",)),
        cost_estimate=pl.CostEstimate(
            flops=int(Bb * (2 * Tq * Hh * Hh + 4 * Tk * Hh * Hh
                            + 4 * Tq * Tk * Hh + 2 * Tq * Hh * Hh)),
            transcendentals=int(Bb * N_HEADS * Tq * Tk),
            bytes_accessed=int(Bb * (Tq + Tk) * Hh * 4 + Bb * Tq * Tk * 4
                               + Bb * N_HEADS * Tq * Tk * 4 + 4 * Hh * Hh * 2),
        ),
    )(xq, xkv, mask, p['wq'], p['bq'].reshape(1, Hh),
      p['wkv'], p['bkv'].reshape(1, 2 * Hh), p['wo'], p['bo'].reshape(1, Hh))
    return out, probs


# =====================================================================================
# Pallas kernel 5: copy-mechanism + cross-entropy loss (module-specific hot path)
#   p_copy        = sigmoid(hidden @ W_copy + b_copy)
#   prev_word_pro = softmax(logits) * (1 - p_copy)
#   ewa           = p_copy * mean_heads(softmax(cross_attn)) * pad_mask
#   word_pro      = scatter_add(prev_word_pro, dim=2, index=enc_ids, src=ewa)
#                   -> implemented as ewa @ onehot(enc_ids)   (MXU matmul)
#   loss          = CrossEntropyLoss(word_pro, labels)  (ignore_index=-100, mean)
# Grid is (batch, Td tiles); outputs are per-tile partial (nll, count).
# =====================================================================================
def _copy_loss_kernel(enc_ids_ref, labels_ref, bcopy_ref, wcopy_ref,
                      logits_ref, hidden_ref, attn_ref, nll_ref, cnt_ref, *, n_heads):
    Tq, V = logits_ref.shape[1], logits_ref.shape[2]
    Te = attn_ref.shape[3]

    hid = hidden_ref[0]            # (Tq, H)
    logits = logits_ref[0]         # (Tq, V)
    ids_col = enc_ids_ref[0]       # (Te, 1) int32
    lab_col = labels_ref[0]        # (Tq, 1) int32
    w_row = wcopy_ref[...]         # (1, H)

    # ---- p_copy = sigmoid(linear_copy(last_hidden_state)); single-exp stable form ----
    pc = jnp.sum(hid * w_row, axis=-1, keepdims=True) + bcopy_ref[...]    # (Tq, 1)
    en = jnp.exp(-jnp.abs(pc))
    p_copy = jnp.where(pc >= 0.0, 1.0 / (1.0 + en), en / (1.0 + en))

    # ---- softmax(logits) * (1 - p_copy) ----
    m = jnp.max(logits, axis=-1, keepdims=True)
    e = jnp.exp(logits - m)
    prob = e / jnp.sum(e, axis=-1, keepdims=True)
    word_pro = prob * (1.0 - p_copy)                                      # (Tq, V)

    # ---- per-head softmax of cross attentions, summed over heads; 1/nH folded ----
    a3 = attn_ref[0]                                                      # (nH, Tq, Te)
    am = jnp.max(a3, axis=-1, keepdims=True)
    ae = jnp.exp(a3 - am)
    asm = ae / jnp.sum(ae, axis=-1, keepdims=True)
    attn_sum = jnp.sum(asm, axis=0)                                       # (Tq, Te)
    ewa = (p_copy * (1.0 / n_heads)) * attn_sum                           # (Tq, Te)

    # ---- scatter_add along vocab as a one-hot MXU matmul, PAD columns masked ----
    iota_te_v = lax.broadcasted_iota(jnp.int32, (Te, V), 1)
    onehot = ((iota_te_v == ids_col) & (ids_col != PAD_ID)).astype(jnp.float32)
    word_pro = word_pro + jnp.dot(ewa, onehot, preferred_element_type=jnp.float32)

    # ---- cross entropy over word_pro (treated as logits), ignore_index=-100 ----
    wm = jnp.max(word_pro, axis=-1, keepdims=True)
    lse = wm + jnp.log(jnp.sum(jnp.exp(word_pro - wm), axis=-1, keepdims=True))
    iota_tq_v = lax.broadcasted_iota(jnp.int32, (Tq, V), 1)
    onehot_lab = (iota_tq_v == lab_col).astype(jnp.float32)               # (Tq, V)
    picked = jnp.sum(word_pro * onehot_lab, axis=-1, keepdims=True)       # (Tq, 1)
    valid = (lab_col != IGNORE_INDEX).astype(jnp.float32)                 # (Tq, 1)

    nll_ref[0, 0] = jnp.sum(valid * (lse - picked), keepdims=True)        # (1, 1)
    cnt_ref[0, 0] = jnp.sum(valid, keepdims=True)                         # (1, 1)


def copy_loss(enc_ids, labels, logits, hidden, attn, w_copy, b_copy, tq=128):
    Bb, Td, V = logits.shape
    Te = enc_ids.shape[1]
    nH = attn.shape[1]
    Hh = hidden.shape[-1]
    tq = min(tq, Td)
    assert Td % tq == 0
    n_qt = Td // tq

    enc3 = enc_ids.astype(jnp.int32).reshape(Bb, Te, 1)
    lab3 = labels.astype(jnp.int32).reshape(Bb, Td, 1)
    w_row = w_copy.reshape(1, Hh).astype(jnp.float32)
    b_2d = b_copy.reshape(1, 1).astype(jnp.float32)

    flops = Bb * (2 * Td * Hh + 5 * Td * V + 5 * nH * Td * Te
                  + 2 * Td * Te * V + Te * V + 4 * Td * V)
    transc = Bb * (2 * Td * V + nH * Td * Te + Td)
    bytes_acc = 4 * (Bb * Td * V + Bb * Td * Hh + Bb * nH * Td * Te
                     + Bb * Te + Bb * Td + Hh + 1 + 2 * Bb)

    nll, cnt = pl.pallas_call(
        functools.partial(_copy_loss_kernel, n_heads=nH),
        out_shape=(jax.ShapeDtypeStruct((Bb, n_qt, 1, 1), jnp.float32),
                   jax.ShapeDtypeStruct((Bb, n_qt, 1, 1), jnp.float32)),
        grid_spec=pltpu.PrefetchScalarGridSpec(
            num_scalar_prefetch=0,
            grid=(Bb, n_qt),
            in_specs=[
                pl.BlockSpec((1, Te, 1), lambda b, q: (b, 0, 0)),        # encoder ids
                pl.BlockSpec((1, tq, 1), lambda b, q: (b, q, 0)),        # labels
                pl.BlockSpec((1, 1), lambda b, q: (0, 0)),               # b_copy
                pl.BlockSpec((1, Hh), lambda b, q: (0, 0)),              # w_copy (row)
                pl.BlockSpec((1, tq, V), lambda b, q: (b, q, 0)),        # logits
                pl.BlockSpec((1, tq, Hh), lambda b, q: (b, q, 0)),       # last hidden
                pl.BlockSpec((1, nH, tq, Te), lambda b, q: (b, 0, q, 0)),  # cross attn
            ],
            out_specs=(pl.BlockSpec((1, 1, 1, 1), lambda b, q: (b, q, 0, 0)),
                       pl.BlockSpec((1, 1, 1, 1), lambda b, q: (b, q, 0, 0))),
        ),
        compiler_params=pltpu.CompilerParams(
            dimension_semantics=("parallel", "arbitrary")),
        cost_estimate=pl.CostEstimate(flops=int(flops),
                                      transcendentals=int(transc),
                                      bytes_accessed=int(bytes_acc)),
    )(enc3, lab3, b_2d, w_row,
      logits.astype(jnp.float32), hidden.astype(jnp.float32), attn.astype(jnp.float32))

    return jnp.sum(nll) / jnp.sum(cnt)


# =====================================================================================
# Tiny BART-style encoder/decoder — embedding lookup / layer norm / residuals are XLA
# glue; all matmul-heavy blocks run in the Pallas kernels above.
# =====================================================================================
def layer_norm(x, p, eps=1e-5):
    mu = jnp.mean(x, axis=-1, keepdims=True)
    var = jnp.mean((x - mu) ** 2, axis=-1, keepdims=True)
    return (x - mu) * lax.rsqrt(var + eps) * p['g'] + p['b']


def init_params(key):
    it = iter(jax.random.split(key, 48))

    def w(shape, scale=0.02, dtype=MM_DTYPE):
        v = scale * jax.random.normal(next(it), shape, dtype=jnp.float32)
        return v.astype(dtype)

    def attn_self_params():
        return dict(wqkv=w((H, 3 * H)), bqkv=jnp.zeros((3 * H,), jnp.float32),
                    wo=w((H, H)), bo=jnp.zeros((H,), jnp.float32))

    def attn_cross_params():
        return dict(wq=w((H, H)), bq=jnp.zeros((H,), jnp.float32),
                    wkv=w((H, 2 * H)), bkv=jnp.zeros((2 * H,), jnp.float32),
                    wo=w((H, H)), bo=jnp.zeros((H,), jnp.float32))

    def ln_params():
        return dict(g=jnp.ones((H,), jnp.float32), b=jnp.zeros((H,), jnp.float32))

    def ffn_params():
        return dict(w1=w((H, FFN)), b1=jnp.zeros((FFN,), jnp.float32),
                    w2=w((FFN, H)), b2=jnp.zeros((H,), jnp.float32))

    tok = w((VOCAB, H), dtype=jnp.float32)
    return dict(
        tok_emb=tok,
        lm_head_w=jnp.transpose(tok).astype(MM_DTYPE),   # pre-transposed bf16 (H, V)
        pos_emb=w((MAX_POS, H), dtype=jnp.float32),
        enc_emb_ln=ln_params(), dec_emb_ln=ln_params(),
        enc_self=attn_self_params(), enc_ln1=ln_params(),
        enc_ffn=ffn_params(), enc_ln2=ln_params(),
        dec_self=attn_self_params(), dec_ln1=ln_params(),
        dec_cross=attn_cross_params(), dec_ln2=ln_params(),
        dec_ffn=ffn_params(), dec_ln3=ln_params(),
        final_logits_bias=jnp.zeros((VOCAB,), jnp.float32),
        w_copy=w((H, 1), scale=0.1, dtype=jnp.float32),   # nn.Linear(H, 1)
        b_copy=jnp.zeros((1,), jnp.float32),
    )


def bart_forward(params, input_ids, attention_mask, dec_ids, dec_mask):
    f32 = jnp.float32
    # ----- encoder -----
    x = params['tok_emb'][input_ids] + params['pos_emb'][:T_ENC][None]
    x = layer_norm(x, params['enc_emb_ln'])
    enc_self_mask = jnp.broadcast_to(
        attention_mask[:, None, :].astype(f32), (B, T_ENC, T_ENC))
    sa = mha_self(x, params['enc_self'], enc_self_mask)
    x = layer_norm(x + sa, params['enc_ln1'])
    x = layer_norm(x + fused_ffn(x, params['enc_ffn']), params['enc_ln2'])
    enc_out = x

    # ----- decoder -----
    y = params['tok_emb'][dec_ids] + params['pos_emb'][:T_DEC][None]
    y = layer_norm(y, params['dec_emb_ln'])
    causal = jnp.tril(jnp.ones((T_DEC, T_DEC), f32))[None]
    dec_self_mask = causal * dec_mask[:, None, :].astype(f32)
    sa = mha_self(y, params['dec_self'], dec_self_mask)
    y = layer_norm(y + sa, params['dec_ln1'])
    cross_mask = jnp.broadcast_to(
        attention_mask[:, None, :].astype(f32), (B, T_DEC, T_ENC))
    ca, cross_probs = mha_cross(y, enc_out, params['dec_cross'], cross_mask)
    y = layer_norm(y + ca, params['dec_ln2'])
    y = layer_norm(y + fused_ffn(y, params['dec_ffn']), params['dec_ln3'])
    dec_hidden = y                                        # decoder_hidden_states[-1]

    # LM head: pre-transposed bf16 weight + final_logits_bias fused into the kernel
    logits = fused_dense(y, params['lm_head_w'], params['final_logits_bias'])
    return logits, dec_hidden, cross_probs


# -------------------- pure-JAX references (validation only) --------------------
def reference_forward(params, input_ids, attention_mask, dec_ids, dec_mask):
    f32 = jnp.float32

    def dense(x, w, b, activation=None):
        y = jnp.einsum('...k,kn->...n', x, w.astype(f32)) + b
        return _gelu(y) if activation == "gelu" else y

    def self_attn(x, p, mask):
        qkv = dense(x, p['wqkv'], p['bqkv'])
        heads = []
        for h in range(N_HEADS):
            lo = h * HEAD_DIM
            q = qkv[..., lo:lo + HEAD_DIM] * (HEAD_DIM ** -0.5)
            k = qkv[..., H + lo:H + lo + HEAD_DIM]
            v = qkv[..., 2 * H + lo:2 * H + lo + HEAD_DIM]
            s = jnp.einsum('bqd,bkd->bqk', q, k)
            s = jnp.where(mask > 0.0, s, NEG_INF)
            pr = jax.nn.softmax(s, axis=-1)
            heads.append(jnp.einsum('bqk,bkd->bqd', pr, v))
        return dense(jnp.concatenate(heads, axis=-1), p['wo'], p['bo'])

    def cross_attn(xq, xkv, p, mask):
        q_all = dense(xq, p['wq'], p['bq'])
        kv = dense(xkv, p['wkv'], p['bkv'])
        heads, probs = [], []
        for h in range(N_HEADS):
            lo = h * HEAD_DIM
            q = q_all[..., lo:lo + HEAD_DIM] * (HEAD_DIM ** -0.5)
            k = kv[..., lo:lo + HEAD_DIM]
            v = kv[..., H + lo:H + lo + HEAD_DIM]
            s = jnp.einsum('bqd,bkd->bqk', q, k)
            s = jnp.where(mask > 0.0, s, NEG_INF)
            pr = jax.nn.softmax(s, axis=-1)
            probs.append(pr)
            heads.append(jnp.einsum('bqk,bkd->bqd', pr, v))
        out = dense(jnp.concatenate(heads, axis=-1), p['wo'], p['bo'])
        return out, jnp.stack(probs, axis=1)

    def ffn_ref(x, p):
        return dense(dense(x, p['w1'], p['b1'], "gelu"), p['w2'], p['b2'])

    x = params['tok_emb'][input_ids] + params['pos_emb'][:T_ENC][None]
    x = layer_norm(x, params['enc_emb_ln'])
    enc_self_mask = jnp.broadcast_to(
        attention_mask[:, None, :].astype(f32), (B, T_ENC, T_ENC))
    x = layer_norm(x + self_attn(x, params['enc_self'], enc_self_mask), params['enc_ln1'])
    x = layer_norm(x + ffn_ref(x, params['enc_ffn']), params['enc_ln2'])
    enc_out = x

    y = params['tok_emb'][dec_ids] + params['pos_emb'][:T_DEC][None]
    y = layer_norm(y, params['dec_emb_ln'])
    causal = jnp.tril(jnp.ones((T_DEC, T_DEC), f32))[None]
    dec_self_mask = causal * dec_mask[:, None, :].astype(f32)
    y = layer_norm(y + self_attn(y, params['dec_self'], dec_self_mask), params['dec_ln1'])
    cross_mask = jnp.broadcast_to(
        attention_mask[:, None, :].astype(f32), (B, T_DEC, T_ENC))
    ca, probs = cross_attn(y, enc_out, params['dec_cross'], cross_mask)
    y = layer_norm(y + ca, params['dec_ln2'])
    y = layer_norm(y + ffn_ref(y, params['dec_ffn']), params['dec_ln3'])
    logits = dense(y, params['lm_head_w'], params['final_logits_bias'])
    return logits, y, probs


def reference_copy_loss(enc_ids, labels, logits, hidden, attn, w_copy, b_copy):
    attn_sm = jax.nn.softmax(attn, axis=-1)
    p_copy = jax.nn.sigmoid(hidden @ w_copy + b_copy)                     # (B,Td,1)
    prev = jax.nn.softmax(logits, axis=-1) * (1.0 - p_copy)
    ewa = p_copy * jnp.mean(attn_sm, axis=1)                              # (B,Td,Te)
    mask = (enc_ids != PAD_ID).astype(jnp.float32)
    ewa = ewa * mask[:, None, :]
    onehot = jax.nn.one_hot(enc_ids, VOCAB, dtype=jnp.float32)            # (B,Te,V)
    word_pro = prev + jnp.einsum('bte,bev->btv', ewa, onehot)
    logp = jax.nn.log_softmax(word_pro, axis=-1).reshape(-1, VOCAB)
    flat_lab = labels.reshape(-1)
    valid = (flat_lab != IGNORE_INDEX).astype(jnp.float32)
    safe_lab = jnp.where(flat_lab == IGNORE_INDEX, 0, flat_lab)
    nll = -jnp.take_along_axis(logp, safe_lab[:, None], axis=-1)[:, 0]
    return jnp.sum(nll * valid) / jnp.sum(valid)


if __name__ == "__main__":
    key = jax.random.PRNGKey(0)
    pkey, k1, k2, k3 = jax.random.split(key, 4)
    params = init_params(pkey)

    input_ids = jax.random.randint(k1, (B, T_ENC), 4, VOCAB, dtype=jnp.int32)
    input_ids = input_ids.at[1, 12:].set(PAD_ID)                  # some padding
    attention_mask = (input_ids != PAD_ID).astype(jnp.int32)
    decoder_input_ids = jax.random.randint(k2, (B, T_DEC), 4, VOCAB, dtype=jnp.int32)
    decoder_attention_mask = jnp.ones((B, T_DEC), jnp.int32)
    labels = jax.random.randint(k3, (B, T_DEC), 4, VOCAB, dtype=jnp.int32)
    labels = labels.at[1, -1].set(IGNORE_INDEX)                   # exercise ignore_index

    logits, dec_hidden, cross_attn = bart_forward(
        params, input_ids, attention_mask, decoder_input_ids, decoder_attention_mask)

    loss = copy_loss(input_ids, labels, logits, dec_hidden, cross_attn,
                     params['w_copy'], params['b_copy'])
    loss = jax.block_until_ready(loss)

    # -- validate forward kernels against a pure-JAX mirror (loose tol: bf16 operands) --
    ref_logits, _, ref_probs = reference_forward(
        params, input_ids, attention_mask, decoder_input_ids, decoder_attention_mask)
    assert bool(jnp.all(jnp.isfinite(logits))), "logits not finite"
    assert bool(jnp.allclose(logits, ref_logits, rtol=2e-2, atol=2e-2)), "logits mismatch"
    assert bool(jnp.allclose(cross_attn, ref_probs, rtol=2e-2, atol=2e-2)), "probs mismatch"

    # -- validate the copy-mechanism + CE loss kernel on identical inputs --
    ref_loss = reference_copy_loss(input_ids, labels, logits, dec_hidden, cross_attn,
                                   params['w_copy'], params['b_copy'])
    assert bool(jnp.isfinite(loss)), "loss is not finite"
    assert bool(jnp.allclose(loss, ref_loss, rtol=5e-3, atol=5e-3)), (float(loss),
                                                                      float(ref_loss))
    print("KERNEL_OK")
</pallas_src>

<mosaic_0001>
module attributes {stable_mosaic.version = 11 : i64} {
  func.func @_self_attn_kernel(%arg0: i32, %arg1: memref<1x16x32xf32, #tpu.memory_space<vmem>>, %arg2: memref<1x16x16xf32, #tpu.memory_space<vmem>>, %arg3: memref<32x96xbf16, #tpu.memory_space<vmem>>, %arg4: memref<1x96xf32, #tpu.memory_space<vmem>>, %arg5: memref<32x32xbf16, #tpu.memory_space<vmem>>, %arg6: memref<1x32xf32, #tpu.memory_space<vmem>>, %arg7: memref<1x16x32xf32, #tpu.memory_space<vmem>>, %arg8: memref<16x32xf32, #tpu.memory_space<vmem>>) attributes {dimension_semantics = [#tpu.dimension_semantics<parallel>], iteration_bounds = array<i64: 2>, scalar_prefetch = 0 : i64, scratch_operands = 1 : i64, tpu.core_type = #tpu.core_type<tc>, window_params = [{transform_indices = @transform_0, window_bounds = array<i64: 1, 16, 32>}, {transform_indices = @transform_1, window_bounds = array<i64: 1, 16, 16>}, {pipeline_mode = #tpu.pipeline_mode<synchronous>, transform_indices = @transform_2, window_bounds = array<i64: 32, 96>}, {pipeline_mode = #tpu.pipeline_mode<synchronous>, transform_indices = @transform_3, window_bounds = array<i64: 1, 96>}, {pipeline_mode = #tpu.pipeline_mode<synchronous>, transform_indices = @transform_4, window_bounds = array<i64: 32, 32>}, {pipeline_mode = #tpu.pipeline_mode<synchronous>, transform_indices = @transform_5, window_bounds = array<i64: 1, 32>}, {transform_indices = @transform_6, window_bounds = array<i64: 1, 16, 32>}]} {
    %c0 = arith.constant 0 : index
    %c0_0 = arith.constant 0 : index
    %c0_1 = arith.constant 0 : index
    %0 = vector.load %arg1[%c0, %c0_0, %c0_1] : memref<1x16x32xf32, #tpu.memory_space<vmem>>, vector<1x16x32xf32>
    %1 = vector.shape_cast %0 : vector<1x16x32xf32> to vector<16x32xf32>
    %2 = arith.truncf %1 : vector<16x32xf32> to vector<16x32xbf16>
    %c0_2 = arith.constant 0 : index
    %c0_3 = arith.constant 0 : index
    %3 = vector.load %arg3[%c0_2, %c0_3] : memref<32x96xbf16, #tpu.memory_space<vmem>>, vector<32x96xbf16>
    %cst = arith.constant dense<0.000000e+00> : vector<16x96xf32>
    %4 = tpu.matmul %2, %3, %cst {dimension_numbers = #tpu.dot_dimension_numbers<[1], [0], [0], [1], [0, 0, 1, 1], [], []>} : vector<16x32xbf16>, vector<32x96xbf16>, vector<16x96xf32> -> vector<16x96xf32>
    %c0_4 = arith.constant 0 : index
    %c0_5 = arith.constant 0 : index
    %5 = vector.load %arg4[%c0_4, %c0_5] : memref<1x96xf32, #tpu.memory_space<vmem>>, vector<1x96xf32>
    %6 = vector.broadcast %5 : vector<1x96xf32> to vector<16x96xf32>
    %7 = arith.addf %4, %6 : vector<16x96xf32>
    %c0_6 = arith.constant 0 : index
    %c0_7 = arith.constant 0 : index
    %c0_8 = arith.constant 0 : index
    %8 = vector.load %arg2[%c0_6, %c0_7, %c0_8] : memref<1x16x16xf32, #tpu.memory_space<vmem>>, vector<1x16x16xf32>
    %9 = vector.shape_cast %8 : vector<1x16x16xf32> to vector<16x16xf32>
    %10 = vector.extract_strided_slice %7 {offsets = [0, 0], sizes = [16, 8], strides = [1, 1]} : vector<16x96xf32> to vector<16x8xf32>
    %cst_9 = arith.constant 0.353553385 : f32
    %11 = vector.broadcast %cst_9 : f32 to vector<16x8xf32>
    %12 = arith.mulf %10, %11 : vector<16x8xf32>
    %13 = vector.extract_strided_slice %7 {offsets = [0, 32], sizes = [16, 8], strides = [1, 1]} : vector<16x96xf32> to vector<16x8xf32>
    %14 = vector.extract_strided_slice %7 {offsets = [0, 64], sizes = [16, 8], strides = [1, 1]} : vector<16x96xf32> to vector<16x8xf32>
    %cst_10 = arith.constant dense<0.000000e+00> : vector<16x16xf32>
    %15 = tpu.matmul %12, %13, %cst_10 {dimension_numbers = #tpu.dot_dimension_numbers<[1], [1], [0], [0], [0, 0, 1, 0], [], []>} : vector<16x8xf32>, vector<16x8xf32>, vector<16x16xf32> -> vector<16x16xf32>
    %cst_11 = arith.constant 0.000000e+00 : f32
    %16 = vector.broadcast %cst_11 : f32 to vector<16x16xf32>
    %17 = arith.cmpf ogt, %9, %16 : vector<16x16xf32>
    %cst_12 = arith.constant -1.000000e+09 : f32
    %18 = vector.broadcast %cst_12 : f32 to vector<16x16xf32>
    %19 = arith.select %17, %15, %18 : vector<16x16xi1>, vector<16x16xf32>
    %cst_13 = arith.constant dense<0xFF800000> : vector<16xf32>
    %20 = vector.multi_reduction <maximumf>, %19, %cst_13 [1] : vector<16x16xf32> to vector<16xf32>
    %21 = vector.shape_cast %20 : vector<16xf32> to vector<16x1xf32>
    %22 = vector.broadcast %21 : vector<16x1xf32> to vector<16x16xf32>
    %23 = arith.subf %19, %22 : vector<16x16xf32>
    %24 = math.exp %23 : vector<16x16xf32>
    %cst_14 = arith.constant dense<0.000000e+00> : vector<16xf32>
    %25 = vector.multi_reduction <add>, %24, %cst_14 [1] : vector<16x16xf32> to vector<16xf32>
    %26 = vector.shape_cast %25 : vector<16xf32> to vector<16x1xf32>
    %27 = vector.broadcast %26 : vector<16x1xf32> to vector<16x16xf32>
    %28 = arith.divf %24, %27 : vector<16x16xf32>
    %29 = arith.truncf %28 : vector<16x16xf32> to vector<16x16xbf16>
    %30 = arith.truncf %14 : vector<16x8xf32> to vector<16x8xbf16>
    %cst_15 = arith.constant dense<0.000000e+00> : vector<16x8xf32>
    %31 = tpu.matmul %29, %30, %cst_15 {dimension_numbers = #tpu.dot_dimension_numbers<[1], [0], [0], [1], [0, 0, 1, 1], [], []>} : vector<16x16xbf16>, vector<16x8xbf16>, vector<16x8xf32> -> vector<16x8xf32>
    %c0_16 = arith.constant 0 : index
    %c0_17 = arith.constant 0 : index
    %32 = vector.load %arg8[%c0_16, %c0_17] : memref<16x32xf32, #tpu.memory_space<vmem>>, vector<16x8xf32>
    tpu.vector_store %arg8[%c0_16, %c0_17], %31 {strides = array<i32>} : memref<16x32xf32, #tpu.memory_space<vmem>>, vector<16x8xf32>,
    %33 = vector.extract_strided_slice %7 {offsets = [0, 8], sizes = [16, 8], strides = [1, 1]} : vector<16x96xf32> to vector<16x8xf32>
    %cst_18 = arith.constant 0.353553385 : f32
    %34 = vector.broadcast %cst_18 : f32 to vector<16x8xf32>
    %35 = arith.mulf %33, %34 : vector<16x8xf32>
    %36 = vector.extract_strided_slice %7 {offsets = [0, 40], sizes = [16, 8], strides = [1, 1]} : vector<16x96xf32> to vector<16x8xf32>
    %37 = vector.extract_strided_slice %7 {offsets = [0, 72], sizes = [16, 8], strides = [1, 1]} : vector<16x96xf32> to vector<16x8xf32>
    %cst_19 = arith.constant dense<0.000000e+00> : vector<16x16xf32>
    %38 = tpu.matmul %35, %36, %cst_19 {dimension_numbers = #tpu.dot_dimension_numbers<[1], [1], [0], [0], [0, 0, 1, 0], [], []>} : vector<16x8xf32>, vector<16x8xf32>, vector<16x16xf32> -> vector<16x16xf32>
    %cst_20 = arith.constant 0.000000e+00 : f32
    %39 = vector.broadcast %cst_20 : f32 to vector<16x16xf32>
    %40 = arith.cmpf ogt, %9, %39 : vector<16x16xf32>
    %cst_21 = arith.constant -1.000000e+09 : f32
    %41 = vector.broadcast %cst_21 : f32 to vector<16x16xf32>
    %42 = arith.select %40, %38, %41 : vector<16x16xi1>, vector<16x16xf32>
    %cst_22 = arith.constant dense<0xFF800000> : vector<16xf32>
    %43 = vector.multi_reduction <maximumf>, %42, %cst_22 [1] : vector<16x16xf32> to vector<16xf32>
    %44 = vector.shape_cast %43 : vector<16xf32> to vector<16x1xf32>
    %45 = vector.broadcast %44 : vector<16x1xf32> to vector<16x16xf32>
    %46 = arith.subf %42, %45 : vector<16x16xf32>
    %47 = math.exp %46 : vector<16x16xf32>
    %cst_23 = arith.constant dense<0.000000e+00> : vector<16xf32>
    %48 = vector.multi_reduction <add>, %47, %cst_23 [1] : vector<16x16xf32> to vector<16xf32>
    %49 = vector.shape_cast %48 : vector<16xf32> to vector<16x1xf32>
    %50 = vector.broadcast %49 : vector<16x1xf32> to vector<16x16xf32>
    %51 = arith.divf %47, %50 : vector<16x16xf32>
    %52 = arith.truncf %51 : vector<16x16xf32> to vector<16x16xbf16>
    %53 = arith.truncf %37 : vector<16x8xf32> to vector<16x8xbf16>
    %cst_24 = arith.constant dense<0.000000e+00> : vector<16x8xf32>
    %54 = tpu.matmul %52, %53, %cst_24 {dimension_numbers = #tpu.dot_dimension_numbers<[1], [0], [0], [1], [0, 0, 1, 1], [], []>} : vector<16x16xbf16>, vector<16x8xbf16>, vector<16x8xf32> -> vector<16x8xf32>
    %c0_25 = arith.constant 0 : index
    %c8 = arith.constant 8 : index
    %55 = vector.load %arg8[%c0_25, %c8] : memref<16x32xf32, #tpu.memory_space<vmem>>, vector<16x8xf32>
    tpu.vector_store %arg8[%c0_25, %c8], %54 {strides = array<i32>} : memref<16x32xf32, #tpu.memory_space<vmem>>, vector<16x8xf32>,
    %56 = vector.extract_strided_slice %7 {offsets = [0, 16], sizes = [16, 8], strides = [1, 1]} : vector<16x96xf32> to vector<16x8xf32>
    %cst_26 = arith.constant 0.353553385 : f32
    %57 = vector.broadcast %cst_26 : f32 to vector<16x8xf32>
    %58 = arith.mulf %56, %57 : vector<16x8xf32>
    %59 = vector.extract_strided_slice %7 {offsets = [0, 48], sizes = [16, 8], strides = [1, 1]} : vector<16x96xf32> to vector<16x8xf32>
    %60 = vector.extract_strided_slice %7 {offsets = [0, 80], sizes = [16, 8], strides = [1, 1]} : vector<16x96xf32> to vector<16x8xf32>
    %cst_27 = arith.constant dense<0.000000e+00> : vector<16x16xf32>
    %61 = tpu.matmul %58, %59, %cst_27 {dimension_numbers = #tpu.dot_dimension_numbers<[1], [1], [0], [0], [0, 0, 1, 0], [], []>} : vector<16x8xf32>, vector<16x8xf32>, vector<16x16xf32> -> vector<16x16xf32>
    %cst_28 = arith.constant 0.000000e+00 : f32
    %62 = vector.broadcast %cst_28 : f32 to vector<16x16xf32>
    %63 = arith.cmpf ogt, %9, %62 : vector<16x16xf32>
    %cst_29 = arith.constant -1.000000e+09 : f32
    %64 = vector.broadcast %cst_29 : f32 to vector<16x16xf32>
    %65 = arith.select %63, %61, %64 : vector<16x16xi1>, vector<16x16xf32>
    %cst_30 = arith.constant dense<0xFF800000> : vector<16xf32>
    %66 = vector.multi_reduction <maximumf>, %65, %cst_30 [1] : vector<16x16xf32> to vector<16xf32>
    %67 = vector.shape_cast %66 : vector<16xf32> to vector<16x1xf32>
    %68 = vector.broadcast %67 : vector<16x1xf32> to vector<16x16xf32>
    %69 = arith.subf %65, %68 : vector<16x16xf32>
    %70 = math.exp %69 : vector<16x16xf32>
    %cst_31 = arith.constant dense<0.000000e+00> : vector<16xf32>
    %71 = vector.multi_reduction <add>, %70, %cst_31 [1] : vector<16x16xf32> to vector<16xf32>
    %72 = vector.shape_cast %71 : vector<16xf32> to vector<16x1xf32>
    %73 = vector.broadcast %72 : vector<16x1xf32> to vector<16x16xf32>
    %74 = arith.divf %70, %73 : vector<16x16xf32>
    %75 = arith.truncf %74 : vector<16x16xf32> to vector<16x16xbf16>
    %76 = arith.truncf %60 : vector<16x8xf32> to vector<16x8xbf16>
    %cst_32 = arith.constant dense<0.000000e+00> : vector<16x8xf32>
    %77 = tpu.matmul %75, %76, %cst_32 {dimension_numbers = #tpu.dot_dimension_numbers<[1], [0], [0], [1], [0, 0, 1, 1], [], []>} : vector<16x16xbf16>, vector<16x8xbf16>, vector<16x8xf32> -> vector<16x8xf32>
    %c0_33 = arith.constant 0 : index
    %c16 = arith.constant 16 : index
    %78 = vector.load %arg8[%c0_33, %c16] : memref<16x32xf32, #tpu.memory_space<vmem>>, vector<16x8xf32>
    tpu.vector_store %arg8[%c0_33, %c16], %77 {strides = array<i32>} : memref<16x32xf32, #tpu.memory_space<vmem>>, vector<16x8xf32>,
    %79 = vector.extract_strided_slice %7 {offsets = [0, 24], sizes = [16, 8], strides = [1, 1]} : vector<16x96xf32> to vector<16x8xf32>
    %cst_34 = arith.constant 0.353553385 : f32
    %80 = vector.broadcast %cst_34 : f32 to vector<16x8xf32>
    %81 = arith.mulf %79, %80 : vector<16x8xf32>
    %82 = vector.extract_strided_slice %7 {offsets = [0, 56], sizes = [16, 8], strides = [1, 1]} : vector<16x96xf32> to vector<16x8xf32>
    %83 = vector.extract_strided_slice %7 {offsets = [0, 88], sizes = [16, 8], strides = [1, 1]} : vector<16x96xf32> to vector<16x8xf32>
    %cst_35 = arith.constant dense<0.000000e+00> : vector<16x16xf32>
    %84 = tpu.matmul %81, %82, %cst_35 {dimension_numbers = #tpu.dot_dimension_numbers<[1], [1], [0], [0], [0, 0, 1, 0], [], []>} : vector<16x8xf32>, vector<16x8xf32>, vector<16x16xf32> -> vector<16x16xf32>
    %cst_36 = arith.constant 0.000000e+00 : f32
    %85 = vector.broadcast %cst_36 : f32 to vector<16x16xf32>
    %86 = arith.cmpf ogt, %9, %85 : vector<16x16xf32>
    %cst_37 = arith.constant -1.000000e+09 : f32
    %87 = vector.broadcast %cst_37 : f32 to vector<16x16xf32>
    %88 = arith.select %86, %84, %87 : vector<16x16xi1>, vector<16x16xf32>
    %cst_38 = arith.constant dense<0xFF800000> : vector<16xf32>
    %89 = vector.multi_reduction <maximumf>, %88, %cst_38 [1] : vector<16x16xf32> to vector<16xf32>
    %90 = vector.shape_cast %89 : vector<16xf32> to vector<16x1xf32>
    %91 = vector.broadcast %90 : vector<16x1xf32> to vector<16x16xf32>
    %92 = arith.subf %88, %91 : vector<16x16xf32>
    %93 = math.exp %92 : vector<16x16xf32>
    %cst_39 = arith.constant dense<0.000000e+00> : vector<16xf32>
    %94 = vector.multi_reduction <add>, %93, %cst_39 [1] : vector<16x16xf32> to vector<16xf32>
    %95 = vector.shape_cast %94 : vector<16xf32> to vector<16x1xf32>
    %96 = vector.broadcast %95 : vector<16x1xf32> to vector<16x16xf32>
    %97 = arith.divf %93, %96 : vector<16x16xf32>
    %98 = arith.truncf %97 : vector<16x16xf32> to vector<16x16xbf16>
    %99 = arith.truncf %83 : vector<16x8xf32> to vector<16x8xbf16>
    %cst_40 = arith.constant dense<0.000000e+00> : vector<16x8xf32>
    %100 = tpu.matmul %98, %99, %cst_40 {dimension_numbers = #tpu.dot_dimension_numbers<[1], [0], [0], [1], [0, 0, 1, 1], [], []>} : vector<16x16xbf16>, vector<16x8xbf16>, vector<16x8xf32> -> vector<16x8xf32>
    %c0_41 = arith.constant 0 : index
    %c24 = arith.constant 24 : index
    %101 = vector.load %arg8[%c0_41, %c24] : memref<16x32xf32, #tpu.memory_space<vmem>>, vector<16x8xf32>
    tpu.vector_store %arg8[%c0_41, %c24], %100 {strides = array<i32>} : memref<16x32xf32, #tpu.memory_space<vmem>>, vector<16x8xf32>,
    %c0_42 = arith.constant 0 : index
    %c0_43 = arith.constant 0 : index
    %102 = vector.load %arg8[%c0_42, %c0_43] : memref<16x32xf32, #tpu.memory_space<vmem>>, vector<16x32xf32>
    %103 = arith.truncf %102 : vector<16x32xf32> to vector<16x32xbf16>
    %c0_44 = arith.constant 0 : index
    %c0_45 = arith.constant 0 : index
    %104 = vector.load %arg5[%c0_44, %c0_45] : memref<32x32xbf16, #tpu.memory_space<vmem>>, vector<32x32xbf16>
    %cst_46 = arith.constant dense<0.000000e+00> : vector<16x32xf32>
    %105 = tpu.matmul %103, %104, %cst_46 {dimension_numbers = #tpu.dot_dimension_numbers<[1], [0], [0], [1], [0, 0, 1, 1], [], []>} : vector<16x32xbf16>, vector<32x32xbf16>, vector<16x32xf32> -> vector<16x32xf32>
    %c0_47 = arith.constant 0 : index
    %c0_48 = arith.constant 0 : index
    %106 = vector.load %arg6[%c0_47, %c0_48] : memref<1x32xf32, #tpu.memory_space<vmem>>, vector<1x32xf32>
    %107 = vector.broadcast %106 : vector<1x32xf32> to vector<16x32xf32>
    %108 = arith.addf %105, %107 : vector<16x32xf32>
    %c0_49 = arith.constant 0 : index
    %c0_50 = arith.constant 0 : index
    %c0_51 = arith.constant 0 : index
    %109 = vector.load %arg7[%c0_49, %c0_50, %c0_51] : memref<1x16x32xf32, #tpu.memory_space<vmem>>, vector<1x16x32xf32>
    %110 = vector.shape_cast %109 : vector<1x16x32xf32> to vector<16x32xf32>
    %111 = vector.shape_cast %108 : vector<16x32xf32> to vector<1x16x32xf32>
    tpu.vector_store %arg7[%c0_49, %c0_50, %c0_51], %111 {strides = array<i32>} : memref<1x16x32xf32, #tpu.memory_space<vmem>>, vector<1x16x32xf32>,
    return
  }
  func.func @transform_0(%arg0: i32) -> (i32, i32, i32) {
    %c0_i32 = arith.constant 0 : i32
    %c0_i32_0 = arith.constant 0 : i32
    %c0_i32_1 = arith.constant 0 : i32
    return %arg0, %c0_i32, %c0_i32_0 : i32, i32, i32
  }
  func.func @transform_1(%arg0: i32) -> (i32, i32, i32) {
    %c0_i32 = arith.constant 0 : i32
    %c0_i32_0 = arith.constant 0 : i32
    %c0_i32_1 = arith.constant 0 : i32
    return %arg0, %c0_i32, %c0_i32_0 : i32, i32, i32
  }
  func.func @transform_2(%arg0: i32) -> (i32, i32) {
    %c0_i32 = arith.constant 0 : i32
    %c0_i32_0 = arith.constant 0 : i32
    %c0_i32_1 = arith.constant 0 : i32
    return %c0_i32, %c0_i32_0 : i32, i32
  }
  func.func @transform_3(%arg0: i32) -> (i32, i32) {
    %c0_i32 = arith.constant 0 : i32
    %c0_i32_0 = arith.constant 0 : i32
    %c0_i32_1 = arith.constant 0 : i32
    return %c0_i32, %c0_i32_0 : i32, i32
  }
  func.func @transform_4(%arg0: i32) -> (i32, i32) {
    %c0_i32 = arith.constant 0 : i32
    %c0_i32_0 = arith.constant 0 : i32
    %c0_i32_1 = arith.constant 0 : i32
    return %c0_i32, %c0_i32_0 : i32, i32
  }
  func.func @transform_5(%arg0: i32) -> (i32, i32) {
    %c0_i32 = arith.constant 0 : i32
    %c0_i32_0 = arith.constant 0 : i32
    %c0_i32_1 = arith.constant 0 : i32
    return %c0_i32, %c0_i32_0 : i32, i32
  }
  func.func @transform_6(%arg0: i32) -> (i32, i32, i32) {
    %c0_i32 = arith.constant 0 : i32
    %c0_i32_0 = arith.constant 0 : i32
    %c0_i32_1 = arith.constant 0 : i32
    return %arg0, %c0_i32, %c0_i32_0 : i32, i32, i32
  }
}

</mosaic_0001>

<bundles_post_ra>
// kernel: tpu_custom_call.1
= control target key start
LH: loop header
LB: loop body
LE: loop exit
PB: predicated region body
PF: predicated region fallthrough
CT: control target
= control target key end

     0   :  { %s2315_s0 = inlined_call_operand.hbm [shape: f32[2,16,32], index: 0, kind: input, shape index: {}]   ;;  %s2316_s1 = inlined_call_operand.hbm [shape: f32[2,16,16], index: 1, kind: input, shape index: {}]   ;;  %s2317_s2 = inlined_call_operand.hbm [shape: bf16[32,96], index: 2, kind: input, shape index: {}]   ;;  %s2318_s3 = inlined_call_operand.vmem [shape: f32[1,96], index: 3, kind: input, shape index: {}]   ;;  %s2319_s4 = inlined_call_operand.hbm [shape: bf16[32,32], index: 4, kind: input, shape index: {}]   ;;  %s2320_s5 = inlined_call_operand.vmem [shape: f32[1,32], index: 5, kind: input, shape index: {}]   ;;  %s2321_s6 = inlined_call_operand.hbm [shape: f32[2,16,32], index: 6, kind: output, shape index: {}]  }
   0x1   :  { %2325 = sst [smem:[#allocation17_spill]] %s2315_s0 }
   0x2   :  { %2326 = sst [smem:[#allocation18_spill]] %s2317_s2 }
   0x3   :  { %2327 = sst [smem:[#allocation19_spill]] %s2319_s4 }
   0x4   :  { %11 = vsyncpa [#allocation4], 0 }
   0x5   :  { %13 = vsyncpa [#allocation4 + $0x1], 0 }
   0x6   :  { %14 = vsyncpa [#allocation7], 0 }
   0x7   :  { %16 = vsyncpa [#allocation7 + $0x1], 0 }
   0x8   :  { %17 = vsyncpa [#allocation10], 0 }
   0x9   :  { %18 = vsyncpa [#allocation5], 0 }
   0xa   :  { %20 = vsyncpa [#allocation5 + $0x1], 0  ;;  %s1890_s21 = smov 0   ;;  %s1892_s22 = smov 0  }
   0xb   :  { %s1894_s23 = smov 0   ;;  %s1896_s24 = smov 0  }
   0xc LB: > { %s1911_s25 = sadd.s32 4294967295, %s1827_s24   ;;  %s1309_s26 = sadd.s32 4294967294, %s1827_s24   ;;  %s1827_s24 = sphi %s1896_s24, %s2351_s24   ;;  %s1823_s23 = sphi %s1894_s23, %s2350_s23   ;;  %s1819_s22 = sphi %s1892_s22, %s2349_s22   ;;  %s1815_s21 = sphi %s1890_s21, %s2348_s21  }
   0xd   : > { %p46_p0 = scmp.ne.s32.totalorder %s1819_s22, %s1815_s21  ;;  %p2322_p1 = scmp.eq.s32.totalorder %s1911_s25, 0 }
   0xe   : > { %p186_p3 = scmp.eq.s32.totalorder %s1309_s26, 1  ;;  %p1310_p5 = scmp.ge.s32.totalorder %s1827_s24, 1 }
   0xf   : > { %p1920_p4 = por %p2322_p1, %p46_p0  ;;  %p193_p7 = scmp.lt.s32.totalorder %s1827_s24, 3 }
  0x10   : > { %p1925_p6 = por %p186_p3, %p46_p0  ;;  %s1829_s30 = smov [#allocation8]  }
  0x11   : > { %s2328_s27 = scalar_select %p1920_p4, 1, 0 }
  0x12   : > { %s2329_s28 = scalar_select %p1925_p6, 1, 0 }
  0x13   : > { %p1930_p8 = pnand %p1310_p5, %p193_p7  ;;  %s205_s7 = sshll.u32 %s1829_s30, 4  ;;  %s1934_s7 = int_to_ptr.vmem [resolvable:$true] %s205_s7 }
  0x14   : > { %s1830_s9 = smov [#allocation9]   ;;  %s2332_s2 = sld [smem:[#allocation18_spill]] }
  0x15   : > { %p1498_p9 = pneg %p1930_p8  ;;  %s221_s10 = sshll.u32 %s1830_s9, 4  ;;  %s1945_s10 = int_to_ptr.vmem [resolvable:$true] %s221_s10 }
  0x17   : > { %p1941_p11 = pnand %p1498_p9, %p2322_p1 }
  0x19   : > { %p1635_p13 = pneg %p1941_p11 }
  0x1a   : > { %s1633_s13 = scalar_lea.hbm %s2332_s2, 256 }
  0x1b   : > { %p1634_p12 = scmp.ne.s32.totalorder %s2332_s2, %s1633_s13  ;;  %p1640_p5 = scmp.lt.u32.totalorder %s1633_s13, %s2332_s2 }
  0x1d   : > { %p1636_p0 = pnand %p1635_p13, %p1634_p12 }
  0x1f   : > { %p1637_p3 = pneg %p1636_p0 }
  0x21   : > { %p1642_p7 = pnand %p1640_p5, %p1637_p3 }
  0x23   : > { %1645 = shalt.err (!%p1642_p7)
}
  0x24   : > { %s1646_s18 = scalar_lea.vmem %s1934_s7, 256  ;;  %p1654_p2 = scmp.lt.s32.totalorder %s1934_s7, %s1934_s7 }
  0x25   : > { %p1647_p9 = scmp.ne.s32.totalorder %s1934_s7, %s1646_s18  ;;  %p1655_p12 = scmp.lt.s32.totalorder %s1646_s18, %s1646_s18 }
  0x27   : > { %p1649_p10 = pnand %p1647_p9, %p1635_p13  ;;  %p1656_p0 = por %p1655_p12, %p1654_p2 }
  0x29   : > { %p1650_p1 = pneg %p1649_p10 }
  0x2b   : > { %p1657_p6 = pnand %p1656_p0, %p1650_p1 }
  0x2d   : > { %1660 = shalt.err (!%p1657_p6)
}
  0x2e   : > { %s1831_s19 = smov 64   ;;  %s1832_s20 = smov 4  }
  0x2f   : > { %1501 = dma.hbm_to_vmem [thread:$0]  (!%p1941_p11), %s2332_s2, 256, %s1934_s7, [#allocation7], %s1831_s19, %s1831_s19, %s1832_s20  }
  0x30   : > { %s2333_s4 = sld [smem:[#allocation19_spill]] }
  0x36   : > { %s1661_s12 = scalar_lea.hbm %s2333_s4, 256 }
  0x37   : > { %p1662_p2 = scmp.ne.s32.totalorder %s2333_s4, %s1661_s12  ;;  %p1668_p10 = scmp.lt.u32.totalorder %s1661_s12, %s2333_s4 }
  0x39   : > { %p1664_p1 = pnand %p1662_p2, %p1635_p13 }
  0x3b   : > { %p1665_p6 = pneg %p1664_p1 }
  0x3d   : > { %p1670_p3 = pnand %p1668_p10, %p1665_p6 }
  0x3f   : > { %1673 = shalt.err (!%p1670_p3)
}
  0x40   : > { %s1674_s7 = scalar_lea.vmem %s1945_s10, 256  ;;  %p1682_p12 = scmp.lt.s32.totalorder %s1945_s10, %s1945_s10 }
  0x41   : > { %p1675_p5 = scmp.ne.s32.totalorder %s1945_s10, %s1674_s7  ;;  %p1683_p0 = scmp.lt.s32.totalorder %s1674_s7, %s1674_s7 }
  0x43   : > { %p1677_p7 = pnand %p1675_p5, %p1635_p13  ;;  %p1684_p2 = por %p1683_p0, %p1682_p12 }
  0x45   : > { %p1678_p9 = pneg %p1677_p7 }
  0x47   : > { %p1685_p1 = pnand %p1684_p2, %p1678_p9 }
  0x49   : > { %1688 = shalt.err (!%p1685_p1)
}
  0x4a   : > { %1504 = dma.hbm_to_vmem [thread:$0]  (!%p1941_p11), %s2333_s4, 256, %s1945_s10, [#allocation10], %s1831_s19, %s1831_s19, %s1832_s20  }
  0x4b   : > { %s2000_s26 = sadd.s32 1, %s1827_s24   ;;  %s33_s8 = sadd.s32 1, %s1823_s23 }
  0x4c   : > { %s30_s30 = ssub.s32 %s1827_s24, %s2000_s26  ;;  %p40_p13 = scmp.ne.s32.totalorder %s1823_s23, %s1819_s22 }
  0x4d   : > { %p31_p6 = scmp.eq.s32.totalorder %s30_s30, 0  ;;  %p41_p10 = scmp.eq.s32.totalorder %s1827_s24, 0 }
  0x4e   : > { %p2334_p3 = scmp.eq.s32.totalorder %s1911_s25, 1  ;;  %p1518_p7 = scmp.lt.s32.totalorder %s1827_s24, 2 }
  0x4f   : > { %s2016_s11 = scalar_select %p31_p6, %s1823_s23, %s33_s8  }
  0x50   : > { %p2010_p5 = por %p2334_p3, %p40_p13  ;;  %p42_p9 = por %p41_p10, %p40_p13 }
  0x51   : > { %s238_s12 = sand.u32 1, %s1823_s23   ;;  %s1359_s10 = sshll.u32 %s1827_s24, 8 }
  0x52   : > { %s2335_s9 = scalar_select %p2010_p5, 1, 0 }
  0x53   : > { %s2019_s13 = sshll.u32 %s238_s12, 4  ;;  %s2336_s0 = sld [smem:[#allocation17_spill]] }
  0x54   : > { %s242_s15 = scalar_lea.vmem [#allocation3], %s2019_s13  ;;  %p2032_p11 = pnand %p1518_p7, %p42_p9 }
  0x55   : > { %s249_s16 = sshll.u32 %s242_s15, 4  ;;  %s2036_s17 = scalar_lea.sflag [#allocation4], %s238_s12  ;;  %s2030_s16 = int_to_ptr.vmem [resolvable:$true] %s249_s16 }
  0x56   : > { %p1691_p0 = pneg %p2032_p11 }
  0x59   : > { %s2027_s14 = scalar_lea.hbm %s2336_s0, %s1359_s10  ;;  %s1694_s19 = scalar_lea.hbm %s2336_s0, 512 }
  0x5a   : > { %s1689_s18 = scalar_lea.hbm %s2027_s14, 256  ;;  %p1695_p13 = scmp.lt.u32.totalorder %s2027_s14, %s2336_s0 }
  0x5b   : > { %p1690_p12 = scmp.ne.s32.totalorder %s2027_s14, %s1689_s18  ;;  %p1696_p6 = scmp.lt.u32.totalorder %s1694_s19, %s1689_s18 }
  0x5c   : > { %p1698_p3 = scmp.lt.u32.totalorder %s1689_s18, %s2027_s14 }
  0x5d   : > { %p1692_p2 = pnand %p1691_p0, %p1690_p12  ;;  %p1697_p10 = por %p1696_p6, %p1695_p13 }
  0x5f   : > { %p1693_p1 = pneg %p1692_p2  ;;  %p1699_p7 = por %p1698_p3, %p1697_p10 }
  0x61   : > { %p1700_p9 = pnand %p1699_p7, %p1693_p1 }
  0x63   : > { %1703 = shalt.err (!%p1700_p9)
}
  0x64   : > { %s1704_s12 = scalar_lea.vmem %s2030_s16, 256  ;;  %s1833_s8 = smov [#allocation3]  }
  0x65   : > { %p1705_p12 = scmp.ne.s32.totalorder %s2030_s16, %s1704_s12  ;;  %s1709_s30 = sshll.u32 %s1833_s8, 4  ;;  %s1710_s30 = int_to_ptr.vmem [resolvable:$false] %s1709_s30 }
  0x66   : > { %s1711_s20 = scalar_lea.vmem %s1710_s30, 512  ;;  %p1712_p4 = scmp.lt.s32.totalorder %s2030_s16, %s1710_s30 }
  0x67   : > { %p1707_p2 = pnand %p1705_p12, %p1691_p0  ;;  %p1713_p13 = scmp.lt.s32.totalorder %s1711_s20, %s1704_s12 }
  0x69   : > { %p1708_p5 = pneg %p1707_p2  ;;  %p1714_p6 = por %p1713_p13, %p1712_p4 }
  0x6b   : > { %p1715_p10 = pnand %p1714_p6, %p1708_p5 }
  0x6d   : > { %1718 = shalt.err (!%p1715_p10)
}
  0x6e   : > { %s1834_s18 = smov 128   ;;  %s1835_s19 = smov 8  }
  0x6f   : > { %1508 = dma.hbm_to_vmem [thread:$0]  (!%p2032_p11), %s2027_s14, 256, %s2030_s16, %s2036_s17, %s1834_s18, %s1834_s18, %s1835_s19  }
  0x70   : > { %s2072_s8 = scalar_lea.hbm %s2316_s1, %s1359_s10  ;;  %s263_s30 = scalar_lea.vmem [#allocation6], %s2019_s13 }
  0x71   : > { %s270_s20 = sshll.u32 %s263_s30, 4  ;;  %s259_s0 = sand.u32 1, %s1827_s24   ;;  %s2075_s20 = int_to_ptr.vmem [resolvable:$true] %s270_s20 }
  0x72   : > { %s2078_s2 = scalar_lea.sflag [#allocation7], %s259_s0  ;;  %s1719_s4 = scalar_lea.hbm %s2072_s8, 256 }
  0x73   : > { %p1720_p4 = scmp.ne.s32.totalorder %s2072_s8, %s1719_s4  ;;  %s1724_s16 = scalar_lea.hbm %s2316_s1, 512 }
  0x74   : > { %p1725_p3 = scmp.lt.u32.totalorder %s2072_s8, %s2316_s1  ;;  %p1726_p7 = scmp.lt.u32.totalorder %s1724_s16, %s1719_s4 }
  0x75   : > { %p1722_p5 = pnand %p1720_p4, %p1691_p0  ;;  %p1728_p12 = scmp.lt.u32.totalorder %s1719_s4, %s2072_s8 }
  0x76   : > { %p1727_p9 = por %p1726_p7, %p1725_p3 }
  0x77   : > { %p1723_p1 = pneg %p1722_p5 }
  0x78   : > { %p1729_p2 = por %p1728_p12, %p1727_p9 }
  0x7a   : > { %p1730_p13 = pnand %p1729_p2, %p1723_p1 }
  0x7c   : > { %1733 = shalt.err (!%p1730_p13)
}
  0x7d   : > { %s1734_s0 = scalar_lea.vmem %s2075_s20, 256  ;;  %s1836_s13 = smov [#allocation6]  }
  0x7e   : > { %p1735_p6 = scmp.ne.s32.totalorder %s2075_s20, %s1734_s0  ;;  %s1739_s12 = sshll.u32 %s1836_s13, 4  ;;  %s1740_s12 = int_to_ptr.vmem [resolvable:$false] %s1739_s12 }
  0x7f   : > { %s1741_s30 = scalar_lea.vmem %s1740_s12, 512  ;;  %p1742_p5 = scmp.lt.s32.totalorder %s2075_s20, %s1740_s12 }
  0x80   : > { %p1737_p10 = pnand %p1735_p6, %p1691_p0  ;;  %p1743_p3 = scmp.lt.s32.totalorder %s1741_s30, %s1734_s0 }
  0x82   : > { %p1738_p4 = pneg %p1737_p10  ;;  %p1744_p7 = por %p1743_p3, %p1742_p5 }
  0x84   : > { %p1745_p9 = pnand %p1744_p7, %p1738_p4 }
  0x86   : > { %1748 = shalt.err (!%p1745_p9)
}
  0x87   : > { %1511 = dma.hbm_to_vmem [thread:$0]  (!%p2032_p11), %s2072_s8, 256, %s2075_s20, %s2078_s2, %s1834_s18, %s1834_s18, %s1835_s19  }
  0x88   : > { %282 = sbr.rel (%p1930_p8) target bundleno = 2157 (0x86d), region = 44  ;;  %s2110_s4 = sand.u32 (!%p1930_p8), 1, %s1819_s22  }
  0x89   : > { %s2113_s14 = sshll.u32 (!%p1930_p8), %s2110_s4, 4  ;;  %s285_s7 = scalar_lea.sflag (!%p1930_p8), [#allocation4], %s2110_s4 }
  0x8a   : > { %s288_s10 = scalar_lea.vmem (!%p1930_p8), [#allocation3], %s2113_s14  ;;  %p2338_p0 = scmp.ne.s32.totalorder (!%p1930_p8), %s2328_s27, 0 }
  0x8f   : > { %1794 = dma.done.wait (%p2338_p0), %s285_s7, 256  }
  0x90   : > { %1796 = vsyncadd (%p2338_p0), %s285_s7, 4294967040  ;;  %s293_s2 = sand.u32 1, %s1911_s25   ;;  %s297_s18 = scalar_lea.vmem [#allocation6], %s2113_s14 }
  0x91   : > { %s294_s29 = scalar_lea.sflag [#allocation7], %s293_s2 }
  0x92   : > { %1798 = dma.done.wait (%p2338_p0), %s294_s29, 256  }
  0x93   : > { %1800 = vsyncadd (%p2338_p0), %s294_s29, 4294967040  ;;  %p2339_p8 = scmp.eq.s32.totalorder %s1911_s25, 0 }
  0x95   : > { %1802 = dma.done.wait (%p2339_p8), [#allocation7], 256   ;;  %p2340_p11 = pmov %p2339_p8 }
  0x96   : > { %p2341_p1 = pmov %p2339_p8 }
  0x97   : > { %1804 = vsyncadd (%p2340_p11), [#allocation7], 4294967040 }
  0x98   : > { %1806 = dma.done.wait (%p2341_p1), [#allocation10], 256   ;;  %p2342_p12 = pmov %p2341_p1 }
  0x99   : > { %v1837_v0 = vmov 0.0   ;;  %vm1838_vm0 = vmmov 0   ;;  %v1597_v1 = vld [vmem:[#allocation8] sm:$0xff]   ;;  %v1598_v2 = vld [vmem:[#allocation8 + $0x8] sm:$0xff]   ;;  %vm366_vm1 = vcmask 261120   ;;  %vm421_vm2 = vcmask 64512  }
  0x9a   : > { %1808 = vsyncadd (%p2342_p12), [#allocation10], 4294967040  ;;  %1392 = vmatprep.subr.bf16.mxu0 %v1837_v0  ;;  %1396 = vmatprep.mubr.msk.bf16.mxu0 %vm1838_vm0, %v1837_v0  ;;  %v340_v3 = vld [vmem:[%s288_s10] sm:$0xff]  ;;  %v341_v4 = vld [vmem:[%s288_s10 + $0x8] sm:$0xff]  ;;  %s1839_s8 = smov 120   ;;  %s1840_s20 = smov 96  }
  0x9b   : > { %1393 = vmatpush3.bf16.msra.mxu0 %v1597_v1  ;;  %v342_v5 = vpack.c.bf16 %v341_v4, %v340_v3  ;;  %v1326_v6 = vld [vmem:[%s2318_s3] ss:$0 sm:$0xff]  ;;  %s1841_s16 = smov 88   ;;  %vm2156_vm3 = vmpackc.low %vm421_vm2, %vm421_vm2  ;;  %v2179_v28 = vld [vmem:[%s297_s18 + $0x8] sm:$0xff]  ;;  %vm511_vm6 = vcmask 130048   ;;  %s1842_s17 = smov 64  }
  0x9c   : > { %1394 = vmatprep.subr.bf16.mxu0 %v1837_v0  ;;  %v2183_v29 = vld [vmem:[%s297_s18] sm:$0xff]  ;;  %vm508_vm4 = vcmp.gt.f32.partialorder %v2179_v28, 0.0  ;;  %s1843_s15 = smov 80   ;;  %s1844_s0 = smov 72   ;;  %vm757_vm7 = vcmask 130112   ;;  %vm931_vm8 = vcmask 195712  }
  0x9d   : > { %vm507_vm5 = vcmp.gt.f32.partialorder %v2183_v29, 0.0  ;;  %s1845_s13 = smov 112   ;;  %s1846_s12 = smov 104   ;;  %vm1105_vm9 = vcmask 261312  }
  0x9e   : > { %s1847_s30 = smov 56   ;;  %s1848_s7 = smov 48  }
  0x9f   : > { %1395 = vmatpush3.bf16.msra.mxu0 %v1598_v2  ;;  %s1849_s10 = smov 8   ;;  %s1850_s2 = smov 40  }
  0xa0   : > { %s1851_s29 = smov 16   ;;  %s1852_s18 = smov 24  }
  0xa1   : > { %p2345_p13 = scmp.ne.s32.totalorder %s2335_s9, 0 }
  0xa2   : > { %1397 = vmatmul.mubr.msk.bf16.vlgmr.msra.gmra.mrb[0].mxu0 %vm366_vm1, %v342_v5 }
 0x175   : > { %v404_v7 = vpop.f32.mrb[0].mxu0 }
 0x176   : > { %v405_v8 = vadd.f32 %v1326_v6, %v404_v7  ;;  %v1398_v9 = vpop.f32.mrb[1].mxu0 }
 0x177   : > { %v407_v10 = vpop.f32.mrb[2].mxu0 }
 0x178   : > { %v408_v11 = vadd.f32 %v1326_v6, %v407_v10  ;;  %v1399_v12 = vpop.f32.mrb[3].mxu0  ;;  %v2143_v13 = vmul.f32 0.35355338, %v405_v8 }
 0x17a   : > { %586 = vrot.lane.b32.xlu1 %v2143_v13, %s1839_s8  ;;  %1404 = vmatprep.mubr.msk.f32.mxu1 %vm421_vm2, %v2143_v13  ;;  %v1577_v14 = vpack.i.bf16 %v408_v11, %v405_v8  ;;  %v2148_v15 = vpack.c.bf16 %v408_v11, %v405_v8  ;;  %v2150_v16 = vmul.f32 0.35355338, %v408_v11 }
 0x17c   : > { %1578 = vrot.lane.b32.xlu0 %v1577_v14, %s1840_s20 }
 0x17e   : > { %588 = vrot.lane.b32.xlu1 %v2150_v16, %s1839_s8  ;;  %s338_s8 = scalar_lea.vmem [#allocation11], %s2113_s14 }
 0x17f   : > { %s1194_s20 = sshll.u32 %s338_s8, 4  ;;  %s2263_s20 = int_to_ptr.vmem [resolvable:$true] %s1194_s20 }
 0x180   : > { %1583 = vrot.lane.b32.xlu0 %v1577_v14, %s1841_s16  ;;  %s1361_s16 = sshll.u32 %s1911_s25, 8  ;;  %s1181_s25 = scalar_lea.sflag [#allocation5], %s2110_s4 }
 0x181   : > { %s2269_s14 = scalar_lea.hbm %s2321_s6, %s1361_s16 }
 0x1ec   : > { %v587_v17 = vpop.permute.xlu1 %586 }
 0x1ed   : > { %1417 = vmatprep.mubr.msk.f32.mxu0 %vm421_vm2, %v587_v17 }
 0x1ee   : > { %v1579_v18 = vpop.permute.xlu0 %1578 }
 0x1ef   : > { %v1581_v19 = vunpack.i.h.bf16 %v1579_v18  ;;  %v1580_v20 = vunpack.i.l.bf16 %v1579_v18 }
 0x1f0   : > { %v589_v27 = vpop.permute.xlu1 %588 }
 0x1f1   : > { %v1460_v22 = vpack.c.bf16 %v1581_v19, %v1580_v20 }
 0x1f2   : > { %v1584_v23 = vpop.permute.xlu0 %1583 }
 0x1f3   : > { %v1586_v24 = vunpack.i.h.bf16 %v1584_v23  ;;  %v1585_v25 = vunpack.i.l.bf16 %v1584_v23  ;;  %1462 = vmatprep.subr.msk.bf16.mxu1 %vm2156_vm3, %v1460_v22 }
 0x1f4   : > { %1465 = vmatpush3.bf16.xpose.msk.msra.mxu1 %vm2156_vm3, %v1460_v22 }
 0x1f5   : > { %v1466_v26 = vpack.c.bf16 %v1586_v24, %v1585_v25  ;;  %1407 = vmatprep.subr.bf16.mxu1 %v1837_v0 }
 0x1f7   : > { %1468 = vmatprep.subr.msk.bf16.mxu0 %vm2156_vm3, %v1466_v26 }
 0x1f8   : > { %1471 = vmatpush3.bf16.xpose.msk.msra.mxu0 %vm2156_vm3, %v1466_v26 }
 0x1f9   : > { %1420 = vmatprep.subr.bf16.mxu0 %v1837_v0 }
 0x1fb   : > { %1405 = vmatmul.mubr.msk.f32.vlgmr.msra.gmra.mrb[0].mxu1 %vm421_vm2, %v2150_v16 }
 0x1fc   : > { %1409 = vmatprep.mubr.msk.bf16.mxu1 %vm1838_vm0, %v1837_v0 }
 0x1ff   : > { %1418 = vmatmul.mubr.msk.f32.vlgmr.msra.gmra.mrb[4].mxu0 %vm421_vm2, %v589_v27 }
 0x200   : > { %1422 = vmatprep.mubr.msk.bf16.mxu0 %vm1838_vm0, %v1837_v0 }
 0x2ce   : > { %v1406_v30 = vpop.f32.mrb[0].mxu1 }
 0x2cf   : > { %v510_v31 = vsel %vm508_vm4, %v1406_v30, -1e+09  ;;  %v498_v32 = vpop.f32.mrb[1].mxu1 }
 0x2d0   : > { %v509_v33 = vsel %vm507_vm5, %v498_v32, -1e+09  ;;  %v515_v34 = vsel %vm511_vm6, %v510_v31, -inf }
 0x2d1   : > { %516 = vmax.xlane.f32.xlu1 %v515_v34  ;;  %v512_v35 = vsel %vm511_vm6, %v509_v33, -inf }
 0x2d2   : > { %513 = vmax.xlane.f32.xlu0 %v512_v35  ;;  %v1419_v36 = vpop.f32.mrb[4].mxu0 }
 0x2d3   : > { %v668_v37 = vpop.f32.mrb[5].mxu0  ;;  %v678_v40 = vsel %vm508_vm4, %v1419_v36, -1e+09 }
 0x2d4   : > { %v677_v38 = vsel %vm507_vm5, %v668_v37, -1e+09  ;;  %v682_v41 = vsel %vm511_vm6, %v678_v40, -inf }
 0x2d5   : > { %v679_v39 = vsel %vm511_vm6, %v677_v38, -inf }
 0x2d6   : > { %680 = vmax.xlane.f32.xlu0 %v679_v39 }
 0x2da   : > { %683 = vmax.xlane.f32.xlu0 %v682_v41 }
 0x2e2   : > { %537 = vrot.lane.b32.xlu1 %v2148_v15, %s1842_s17 }
 0x2e6   : > { %1588 = vrot.lane.b32.xlu1 %v1577_v14, %s1843_s15 }
 0x2ea   : > { %1593 = vrot.lane.b32.xlu1 %v1577_v14, %s1844_s0  ;;  %s1749_s0 = scalar_lea.vmem %s2263_s20, 256 }
 0x2eb   : > { %p1750_p2 = scmp.ne.s32.totalorder %s2263_s20, %s1749_s0 }
 0x2ed   : > { %p1751_p6 = pnand %p1750_p2, %p2345_p13 }
 0x2ef   : > { %p1752_p10 = pneg %p1751_p6 }
 0x35e   : > { %v517_v42 = vpop.xlane.xlu1 %516 }
 0x35f   : > { %v519_v43 = vsub.f32 %v510_v31, %v517_v42  ;;  %v514_v44 = vpop.xlane.xlu0 %513 }
 0x360   : > { %v518_v45 = vsub.f32 %v509_v33, %v514_v44 }
 0x361   : > { %v522_v46 = vmul.f32 1.442695, %v519_v43 }
 0x362   : > { %v520_v47 = vmul.f32 1.442695, %v518_v45  ;;  %v538_v48 = vpop.permute.xlu1 %537 }
 0x363   : > { %1601 = vpow2.f32 %v522_v46  ;;  %1408 = vmatpush3.bf16.msra.mxu1 %v538_v48  ;;  %v681_v49 = vpop.xlane.xlu0 %680 }
 0x364   : > { %1603 = vpow2.f32 %v520_v47  ;;  %v685_v50 = vsub.f32 %v677_v38, %v681_v49 }
 0x366   : > { %v687_v51 = vmul.f32 1.442695, %v685_v50  ;;  %v1589_v52 = vpop.permute.xlu1 %1588 }
 0x367   : > { %v1591_v53 = vunpack.i.h.bf16 %v1589_v52  ;;  %v1590_v54 = vunpack.i.l.bf16 %v1589_v52  ;;  %v684_v55 = vpop.xlane.xlu0 %683 }
 0x368   : > { %1605 = vpow2.f32 %v687_v51  ;;  %v686_v56 = vsub.f32 %v678_v40, %v684_v55 }
 0x369   : > { %v1472_v57 = vpack.c.bf16 %v1591_v53, %v1590_v54 }
 0x36a   : > { %v689_v58 = vmul.f32 1.442695, %v686_v56  ;;  %v1594_v4 = vpop.permute.xlu1 %1593 }
 0x36b   : > { %1474 = vmatprep.subr.msk.bf16.mxu1 %vm2156_vm3, %v1472_v57  ;;  %v1596_v8 = vunpack.i.h.bf16 %v1594_v4  ;;  %v1595_v9 = vunpack.i.l.bf16 %v1594_v4 }
 0x36c   : > { %1607 = vpow2.f32 %v689_v58 }
 0x36d   : > { %v1602_v59 = vpop.eup %1601 }
 0x36e   : > { %v1604_v60 = vpop.eup %1603  ;;  %v527_v61 = vsel %vm511_vm6, %v1602_v59, 0.0 }
 0x36f   : > { %528 = vadd.xlane.f32.xlu0 %v527_v61  ;;  %v524_v62 = vsel %vm511_vm6, %v1604_v60, 0.0 }
 0x370   : > { %525 = vadd.xlane.f32.xlu1 %v524_v62 }
 0x372   : > { %v1606_v63 = vpop.eup %1605 }
 0x373   : > { %v691_v1 = vsel %vm511_vm6, %v1606_v63, 0.0 }
 0x374   : > { %692 = vadd.xlane.f32.xlu1 %v691_v1 }
 0x376   : > { %v1608_v2 = vpop.eup %1607 }
 0x377   : > { %v694_v3 = vsel %vm511_vm6, %v1608_v2, 0.0 }
 0x378   : > { %695 = vadd.xlane.f32.xlu0 %v694_v3 }
 0x385   : > { %762 = vrot.lane.b32.xlu1 %v2150_v16, %s1845_s13 }
 0x389   : > { %936 = vrot.lane.b32.xlu1 %v2150_v16, %s1846_s12  ;;  %v1478_v16 = vpack.c.bf16 %v1596_v8, %v1595_v9 }
 0x38e   : > { %702 = vrot.lane.b32.xlu0 %v2148_v15, %s1847_s30 }
 0x392   : > { %760 = vrot.lane.b32.xlu0 %v2143_v13, %s1845_s13  ;;  %s1853_s13 = smov [#allocation11]  }
 0x396   : > { %934 = vrot.lane.b32.xlu0 %v2143_v13, %s1846_s12  ;;  %s1753_s12 = sshll.u32 %s1853_s13, 4  ;;  %s1754_s12 = int_to_ptr.vmem [resolvable:$false] %s1753_s12 }
 0x397   : > { %s1755_s30 = scalar_lea.vmem %s1754_s12, 512  ;;  %p1756_p4 = scmp.lt.s32.totalorder %s2263_s20, %s1754_s12 }
 0x398   : > { %p1757_p5 = scmp.lt.s32.totalorder %s1755_s30, %s1749_s0 }
 0x39a   : > { %p1758_p3 = por %p1757_p5, %p1756_p4 }
 0x39c   : > { %p1759_p7 = pnand %p1758_p3, %p1752_p10 }
 0x3fc   : > { %v529_v5 = vpop.xlane.xlu0 %528 }
 0x3fd   : > { %1609 = vrcp.f32 %v529_v5  ;;  %v526_v6 = vpop.xlane.xlu1 %525 }
 0x3fe   : > { %1611 = vrcp.f32 %v526_v6 }
 0x401   : > { %v693_v7 = vpop.xlane.xlu1 %692 }
 0x402   : > { %1613 = vrcp.f32 %v693_v7 }
 0x405   : > { %v696_v10 = vpop.xlane.xlu0 %695  ;;  %v763_v26 = vpop.permute.xlu1 %762 }
 0x406   : > { %1615 = vrcp.f32 %v696_v10 }
 0x407   : > { %v1610_v11 = vpop.eup %1609 }
 0x408   : > { %v1612_v12 = vpop.eup %1611  ;;  %v533_v14 = vmul.f32 %v1610_v11, %v1602_v59 }
 0x409   : > { %v531_v17 = vmul.f32 %v1612_v12, %v1604_v60  ;;  %v703_v18 = vpop.permute.xlu0 %702  ;;  %v937_v30 = vpop.permute.xlu1 %936 }
 0x40a   : > { %1421 = vmatpush3.bf16.msra.mxu0 %v703_v18 }
 0x40b   : > { %1480 = vmatprep.subr.msk.bf16.mxu0 %vm2156_vm3, %v1478_v16  ;;  %v534_v13 = vpack.c.bf16 %v533_v14, %v531_v17 }
 0x40c   : > { %v1614_v20 = vpop.eup %1613 }
 0x40d   : > { %1410 = vmatmul.mubr.msk.bf16.vlgmr.msra.gmra.mrb[4].mxu1 %vm511_vm6, %v534_v13  ;;  %v761_v19 = vpop.permute.xlu0 %760  ;;  %v698_v23 = vmul.f32 %v1614_v20, %v1606_v63 }
 0x40e   : > { %1477 = vmatpush3.bf16.xpose.msk.msra.mxu1 %vm2156_vm3, %v1472_v57  ;;  %1430 = vmatprep.mubr.msk.f32.mxu1 %vm421_vm2, %v761_v19 }
 0x40f   : > { %1433 = vmatprep.subr.bf16.mxu1 %v1837_v0 }
 0x410   : > { %v1616_v22 = vpop.eup %1615 }
 0x411   : > { %v700_v24 = vmul.f32 %v1616_v22, %v1608_v2  ;;  %v935_v27 = vpop.permute.xlu0 %934 }
 0x413   : > { %v701_v25 = vpack.c.bf16 %v700_v24, %v698_v23 }
 0x415   : > { %1423 = vmatmul.mubr.msk.bf16.vlgmr.msra.gmra.mrb[8].mxu0 %vm511_vm6, %v701_v25  ;;  %1431 = vmatmul.mubr.msk.f32.vlgmr.msra.gmra.mrb[2].mxu1 %vm421_vm2, %v763_v26 }
 0x416   : > { %1483 = vmatpush3.bf16.xpose.msk.msra.mxu0 %vm2156_vm3, %v1478_v16  ;;  %1443 = vmatprep.mubr.msk.f32.mxu0 %vm421_vm2, %v935_v27  ;;  %v1599_v27 = vld [vmem:[#allocation9] sm:$0xff]  }
 0x417   : > { %1435 = vmatprep.mubr.msk.bf16.mxu1 %vm1838_vm0, %v1837_v0  ;;  %1446 = vmatprep.subr.bf16.mxu0 %v1837_v0 }
 0x41d   : > { %1444 = vmatmul.mubr.msk.f32.vlgmr.msra.gmra.mrb[6].mxu0 %vm421_vm2, %v937_v30 }
 0x41e   : > { %1448 = vmatprep.mubr.msk.bf16.mxu0 %vm1838_vm0, %v1837_v0 }
 0x4e0   : > { %v577_v31 = vpop.f32.mrb[4].mxu1 }
 0x4e1   : > { %584 = vst.msk [vmem:[#allocation2] sm:$0xff] %vm421_vm2, %v577_v31  ;;  %v1411_v32 = vpop.f32.mrb[5].mxu1  ;;  %v1600_v31 = vld [vmem:[#allocation9 + $0x8] sm:$0xff]  }
 0x4e2   : > { %v580_v33 = vpop.f32.mrb[6].mxu1 }
 0x4e3   : > { %585 = vst.msk [vmem:[#allocation2 + $0x8] sm:$0xff] %vm421_vm2, %v580_v33  ;;  %v1412_v21 = vpop.f32.mrb[7].mxu1 }
 0x4e8   : > { %v742_v34 = vpop.f32.mrb[8].mxu0  ;;  %v1432_v35 = vpop.f32.mrb[2].mxu1 }
 0x4e9   : > { %v852_v36 = vsel %vm508_vm4, %v1432_v35, -1e+09  ;;  %v1424_v37 = vpop.f32.mrb[9].mxu0  ;;  %v842_v38 = vpop.f32.mrb[3].mxu1 }
 0x4ea   : > { %v851_v39 = vsel %vm507_vm5, %v842_v38, -1e+09  ;;  %v745_v40 = vpop.f32.mrb[10].mxu0  ;;  %v856_v41 = vsel %vm511_vm6, %v852_v36, -inf }
 0x4eb   : > { %v1425_v42 = vpop.f32.mrb[11].mxu0  ;;  %857 = vmax.xlane.f32.xlu1 %v856_v41  ;;  %v853_v43 = vsel %vm511_vm6, %v851_v39, -inf  ;;  %v1350_v41 = vld [vmem:[%s2320_s5] ss:$0 sm:$0xff] }
 0x4ec   : > { %854 = vmax.xlane.f32.xlu0 %v853_v43 }
 0x4f0   : > { %v1445_v44 = vpop.f32.mrb[6].mxu0 }
 0x4f1   : > { %v1016_v45 = vpop.f32.mrb[7].mxu0  ;;  %v1026_v48 = vsel %vm508_vm4, %v1445_v44, -1e+09 }
 0x4f2   : > { %v1025_v46 = vsel %vm507_vm5, %v1016_v45, -1e+09  ;;  %v1030_v49 = vsel %vm511_vm6, %v1026_v48, -inf }
 0x4f3   : > { %v1027_v47 = vsel %vm511_vm6, %v1025_v46, -inf }
 0x4f4   : > { %1028 = vmax.xlane.f32.xlu0 %v1027_v47 }
 0x4f8   : > { %1031 = vmax.xlane.f32.xlu0 %v1030_v49 }
 0x578   : > { %v858_v50 = vpop.xlane.xlu1 %857 }
 0x579   : > { %v860_v51 = vsub.f32 %v852_v36, %v858_v50  ;;  %v855_v52 = vpop.xlane.xlu0 %854 }
 0x57a   : > { %v859_v53 = vsub.f32 %v851_v39, %v855_v52 }
 0x57b   : > { %v863_v54 = vmul.f32 1.442695, %v860_v51 }
 0x57c   : > { %v861_v55 = vmul.f32 1.442695, %v859_v53 }
 0x57d   : > { %1617 = vpow2.f32 %v863_v54 }
 0x57e   : > { %1619 = vpow2.f32 %v861_v55 }
 0x581   : > { %v1029_v56 = vpop.xlane.xlu0 %1028 }
 0x582   : > { %v1033_v29 = vsub.f32 %v1025_v46, %v1029_v56 }
 0x584   : > { %v1035_v57 = vmul.f32 1.442695, %v1033_v29 }
 0x585   : > { %v1032_v58 = vpop.xlane.xlu0 %1031 }
 0x586   : > { %1621 = vpow2.f32 %v1035_v57  ;;  %v1034_v59 = vsub.f32 %v1026_v48, %v1032_v58 }
 0x587   : > { %v1618_v28 = vpop.eup %1617 }
 0x588   : > { %v1620_v60 = vpop.eup %1619  ;;  %v1037_v61 = vmul.f32 1.442695, %v1034_v59  ;;  %v868_v62 = vsel %vm511_vm6, %v1618_v28, 0.0 }
 0x589   : > { %869 = vadd.xlane.f32.xlu0 %v868_v62  ;;  %v865_v63 = vsel %vm511_vm6, %v1620_v60, 0.0 }
 0x58a   : > { %1623 = vpow2.f32 %v1037_v61  ;;  %866 = vadd.xlane.f32.xlu1 %v865_v63 }
 0x590   : > { %v1622_v1 = vpop.eup %1621 }
 0x591   : > { %v1039_v2 = vsel %vm511_vm6, %v1622_v1, 0.0 }
 0x592   : > { %1040 = vadd.xlane.f32.xlu1 %v1039_v2 }
 0x594   : > { %v1624_v3 = vpop.eup %1623 }
 0x595   : > { %v1042_v4 = vsel %vm511_vm6, %v1624_v3, 0.0 }
 0x596   : > { %1043 = vadd.xlane.f32.xlu0 %v1042_v4 }
 0x5a3   : > { %876 = vrot.lane.b32.xlu1 %v2148_v15, %s1848_s7 }
 0x5a7   : > { %751 = vrot.lane.b32.xlu1 %v742_v34, %s1849_s10 }
 0x5ab   : > { %753 = vrot.lane.b32.xlu1 %v745_v40, %s1849_s10 }
 0x5ac   : > { %1050 = vrot.lane.b32.xlu0 %v2148_v15, %s1850_s2 }
 0x616   : > { %v870_v5 = vpop.xlane.xlu0 %869 }
 0x617   : > { %1625 = vrcp.f32 %v870_v5  ;;  %v867_v6 = vpop.xlane.xlu1 %866 }
 0x618   : > { %1627 = vrcp.f32 %v867_v6 }
 0x61f   : > { %v1041_v7 = vpop.xlane.xlu1 %1040 }
 0x620   : > { %1629 = vrcp.f32 %v1041_v7 }
 0x621   : > { %v1626_v8 = vpop.eup %1625 }
 0x622   : > { %v1628_v9 = vpop.eup %1627  ;;  %v874_v10 = vmul.f32 %v1626_v8, %v1618_v28 }
 0x623   : > { %v872_v11 = vmul.f32 %v1628_v9, %v1620_v60  ;;  %v877_v12 = vpop.permute.xlu1 %876  ;;  %v1044_v14 = vpop.xlane.xlu0 %1043 }
 0x624   : > { %1631 = vrcp.f32 %v1044_v14  ;;  %1434 = vmatpush3.bf16.msra.mxu1 %v877_v12 }
 0x625   : > { %v875_v16 = vpack.c.bf16 %v874_v10, %v872_v11  ;;  %1452 = vmatprep.subr.bf16.mxu1 %v1837_v0 }
 0x627   : > { %v752_v17 = vpop.permute.xlu1 %751  ;;  %1436 = vmatmul.mubr.msk.bf16.vlgmr.msra.gmra.mrb[8].mxu1 %vm511_vm6, %v875_v16  ;;  %v1051_v15 = vpop.permute.xlu0 %1050 }
 0x628   : > { %758 = vst.msk [vmem:[#allocation2] sm:$0xff] %vm757_vm7, %v752_v17  ;;  %1447 = vmatpush3.bf16.msra.mxu0 %v1051_v15  ;;  %1456 = vmatprep.mubr.msk.bf16.mxu1 %vm1838_vm0, %v1837_v0 }
 0x629   : > { %1453 = vmatpush3.bf16.msra.mxu1 %v1599_v27 }
 0x62a   : > { %v1630_v13 = vpop.eup %1629  ;;  %1454 = vmatprep.subr.bf16.mxu1 %v1837_v0 }
 0x62b   : > { %v754_v18 = vpop.permute.xlu1 %753  ;;  %v1046_v20 = vmul.f32 %v1630_v13, %v1622_v1 }
 0x62c   : > { %759 = vst.msk [vmem:[#allocation2 + $0x8] sm:$0xff] %vm757_vm7, %v754_v18 }
 0x62d   : > { %1455 = vmatpush3.bf16.msra.mxu1 %v1600_v31 }
 0x62e   : > { %v1632_v19 = vpop.eup %1631 }
 0x62f   : > { %v1048_v22 = vmul.f32 %v1632_v19, %v1624_v3 }
 0x631   : > { %v1049_v23 = vpack.c.bf16 %v1048_v22, %v1046_v20 }
 0x633   : > { %1449 = vmatmul.mubr.msk.bf16.vlgmr.msra.gmra.mrb[12].mxu0 %vm511_vm6, %v1049_v23 }
 0x6fa   : > { %v916_v24 = vpop.f32.mrb[8].mxu1 }
 0x6fb   : > { %925 = vrot.lane.b32.xlu0 %v916_v24, %s1851_s29  ;;  %v1437_v25 = vpop.f32.mrb[9].mxu1 }
 0x6fc   : > { %v919_v26 = vpop.f32.mrb[10].mxu1 }
 0x6fd   : > { %927 = vrot.lane.b32.xlu1 %v919_v26, %s1851_s29  ;;  %v1438_v30 = vpop.f32.mrb[11].mxu1 }
 0x706   : > { %v1090_v32 = vpop.f32.mrb[12].mxu0 }
 0x707   : > { %1099 = vrot.lane.b32.xlu0 %v1090_v32, %s1852_s18  ;;  %v1450_v33 = vpop.f32.mrb[13].mxu0 }
 0x708   : > { %v1093_v21 = vpop.f32.mrb[14].mxu0 }
 0x709   : > { %1101 = vrot.lane.b32.xlu1 %v1093_v21, %s1852_s18  ;;  %v1451_v34 = vpop.f32.mrb[15].mxu0 }
 0x76d   : > { %v926_v35 = vpop.permute.xlu0 %925 }
 0x76e   : > { %932 = vst.msk [vmem:[#allocation2] sm:$0xff] %vm931_vm8, %v926_v35 }
 0x76f   : > { %v928_v36 = vpop.permute.xlu1 %927 }
 0x770   : > { %933 = vst.msk [vmem:[#allocation2 + $0x8] sm:$0xff] %vm931_vm8, %v928_v36 }
 0x779   : > { %v1100_v37 = vpop.permute.xlu0 %1099 }
 0x77a   : > { %1106 = vst.msk [vmem:[#allocation2] sm:$0xff] %vm1105_vm9, %v1100_v37 }
 0x77b   : > { %v1102_v38 = vpop.permute.xlu1 %1101 }
 0x77c   : > { %1107 = vst.msk [vmem:[#allocation2 + $0x8] sm:$0xff] %vm1105_vm9, %v1102_v38 }
 0x781   : > { %v1108_v0 = vld [vmem:[#allocation2] sm:$0xff] }
 0x783   : > { %v1109_v39 = vld [vmem:[#allocation2 + $0x8] sm:$0xff] }
 0x784   : > { %v1110_v40 = vpack.c.bf16 %v1109_v39, %v1108_v0 }
 0x786   : > { %1457 = vmatmul.mubr.msk.bf16.vlgmr.msra.gmra.mrb[12].mxu1 %vm366_vm1, %v1110_v40 }
 0x859   : > { %v1171_v42 = vpop.f32.mrb[12].mxu1 }
 0x85a   : > { %v1172_v43 = vadd.f32 %v1350_v41, %v1171_v42  ;;  %v1458_v44 = vpop.f32.mrb[13].mxu1 }
 0x85b   : > { %v1174_v45 = vpop.f32.mrb[14].mxu1 }
 0x85c   : > { %1178 = vst.msk [vmem:[%s338_s8] sm:$0xff] %vm366_vm1, %v1172_v43  ;;  %v1175_v46 = vadd.f32 %v1350_v41, %v1174_v45  ;;  %v1459_v47 = vpop.f32.mrb[15].mxu1 }
 0x85e   : > { %1179 = vst.msk [vmem:[%s338_s8 + $0x8] sm:$0xff] %vm366_vm1, %v1175_v46 }
 0x85f   : > { %1762 = shalt.err (!%p1759_p7)
}
 0x860   : > { %s1763_s7 = scalar_lea.hbm %s2269_s14, 256  ;;  %s1767_s18 = scalar_lea.hbm %s2321_s6, 512 }
 0x861   : > { %p1764_p9 = scmp.ne.s32.totalorder %s2269_s14, %s1763_s7  ;;  %p1768_p11 = scmp.lt.u32.totalorder %s2269_s14, %s2321_s6 }
 0x862   : > { %p1769_p1 = scmp.lt.u32.totalorder %s1767_s18, %s1763_s7  ;;  %p1771_p2 = scmp.lt.u32.totalorder %s1763_s7, %s2269_s14 }
 0x863   : > { %p1765_p0 = pnand %p1764_p9, %p2345_p13 }
 0x864   : > { %p1770_p12 = por %p1769_p1, %p1768_p11 }
 0x865   : > { %p1766_p8 = pneg %p1765_p0 }
 0x866   : > { %p1772_p6 = por %p1771_p2, %p1770_p12 }
 0x868   : > { %p1773_p10 = pnand %p1772_p6, %p1766_p8 }
 0x86a   : > { %1776 = shalt.err (!%p1773_p10)
}
 0x86b   : > { %s1854_s8 = smov 128  }
 0x86c   : > { %1496 = dma.vmem_to_hbm [thread:$0]  (%p2345_p13), %s2263_s20, 256, %s2269_s14, %s1181_s25, %s1854_s8, %s1854_s8, %s1849_s10  }
 0x86d PF: > { %s1209_s16 = sand.u32 1, %s1815_s21   ;;  %p2346_p4 = scmp.ne.s32.totalorder %s2329_s28, 0 }
 0x86e   : > { %p2347_p5 = scmp.ge.s32.totalorder %s1827_s24, 2  ;;  %s1210_s17 = scalar_lea.sflag [#allocation5], %s1209_s16 }
 0x870   : > { %p1513_p3 = pnand %p2347_p5, %p2346_p4 }
 0x872   : > { %1810 = dma.done.wait (!%p1513_p3), %s1210_s17, 256  }
 0x873   : > { %1812 = vsyncadd (!%p1513_p3), %s1210_s17, 4294967040  ;;  %p23_p7 = scmp.ge.s32.totalorder %s2000_s26, 4   ;;  %s2348_s21 = smov %s1819_s22 }
 0x874   : > { %s2349_s22 = smov %s1823_s23  ;;  %s2350_s23 = smov %s2016_s11 }
 0x875   : > { %s2351_s24 = smov %s2000_s26  ;;  %25 = sbr.rel (!%p23_p7) target bundleno = 12 (0xc), region = 110 }
 0x87c   :  { %1215 = vsyncpa [#allocation4], 1 }
 0x87d   :  { %1217 = vsyncpa [#allocation4 + $0x1], 1 }
 0x87e   :  { %1218 = vsyncpa [#allocation7], 1 }
 0x87f   :  { %1220 = vsyncpa [#allocation7 + $0x1], 1 }
 0x880   :  { %1221 = vsyncpa [#allocation10], 1 }
 0x881   :  { %1222 = vsyncpa [#allocation5], 1 }
 0x882   :  { %1224 = vsyncpa [#allocation5 + $0x1], 1 }

</bundles_post_ra>
